<compile_context>
chip_gen: v5e
topology: v5e:2x2
jax: 0.10.0
libtpu: 0.0.40
codegen_flags: <defaults>
</compile_context>

<pallas_src>
import functools

import numpy as np
import jax
import jax.numpy as jnp
from jax import lax
from jax.experimental import pallas as pl
from jax.experimental.pallas import tpu as pltpu


# ------------------------------------------------------------------ kernels

def _bilstm_layer_kernel(x_ref, wih_ref, whh_ref, b_ref, out_ref,
                         pg_scr, h_scr, c_scr, *, T, B, H):
    """One bidirectional LSTM layer; grid=(2,) over direction (0=fwd, 1=bwd).

    x_ref:   (T*B, D)  f32  time-major input, flattened (t, b) rows (shared by both dirs)
    wih_ref: (D, 4H)   bf16 input->gates weights for this direction (pre-transposed)
    whh_ref: (H, 4H)   bf16 hidden->gates weights for this direction (pre-transposed)
    b_ref:   (1, 4H)   f32  b_ih + b_hh for this direction
    out_ref: (T*B, H)  f32  per-step hidden states for this direction
    pg_scr:  (T*B, 4H) f32  scratch holding the hoisted input projection
    h_scr, c_scr: (B, H) f32 scratch carrying the recurrence
    """
    d = pl.program_id(0)  # 0 = forward (t = 0..T-1), 1 = backward (t = T-1..0)

    # Hoisted input projection: ONE (T*B, D) @ (D, 4H) MXU matmul + one bias add instead
    # of T tiny matmuls + T re-materialized bias broadcasts inside the recurrence.
    pg_scr[...] = (jnp.dot(x_ref[...].astype(jnp.bfloat16), wih_ref[...],
                           preferred_element_type=jnp.float32)
                   + b_ref[...])

    h_scr[...] = jnp.zeros_like(h_scr)
    c_scr[...] = jnp.zeros_like(c_scr)

    # Lane mask selecting the tanh ('g') band of the fused (B, 4H) gate vector, so the
    # transcendentals run once over the full vreg (EUP) instead of 4 narrow slices.
    lane = lax.broadcasted_iota(jnp.int32, (B, 4 * H), 1)
    g_band = (lane >= 2 * H) & (lane < 3 * H)

    def step(s, carry):
        # Backward direction indexes time in reverse here, so the wrapper never pays a
        # full-activation [::-1] HBM copy per layer.
        t = jnp.where(d == 0, s, T - 1 - s)
        row = pl.multiple_of(t * B, B)
        gates = (pg_scr[pl.ds(row, B), :]
                 + jnp.dot(h_scr[...].astype(jnp.bfloat16), whh_ref[...],
                           preferred_element_type=jnp.float32))      # (B, 4H) f32
        act = jnp.where(g_band, jnp.tanh(gates), jax.nn.sigmoid(gates))
        # PyTorch gate order: i, f, g, o
        i = act[:, 0:H]
        f = act[:, H:2 * H]
        g = act[:, 2 * H:3 * H]
        o = act[:, 3 * H:4 * H]
        c_new = f * c_scr[...] + i * g
        h_new = o * jnp.tanh(c_new)
        c_scr[...] = c_new
        h_scr[...] = h_new
        out_ref[pl.ds(row, B), :] = h_new
        return carry

    # Short static trip-count: fully unroll so MXU pops / EUP transcendentals / VPU
    # updates from adjacent steps can co-issue in the same bundles.
    lax.fori_loop(0, T, step, 0, unroll=True)
    # TODO(synk): for large T / H on v7x (64 MiB VMEM), add a grid over time-chunks
    # (output BlockSpec constant across the chunk axis, h/c carried in scratch,
    # axis marked "arbitrary") instead of holding the whole sequence in VMEM.


def _fc_kernel(x_ref, w_ref, b_ref, o_ref):
    """Linear layer: (N, F) @ (F, O_pad) + (1, O_pad); O pre-padded to 128 lanes."""
    o_ref[...] = (jnp.dot(x_ref[...].astype(jnp.bfloat16), w_ref[...],
                          preferred_element_type=jnp.float32)
                  + b_ref[...])


# ------------------------------------------------------------------ wrappers

def run_bilstm_layer(x, layer_params):
    """x: (T, B, D) f32 -> (T, B, 2H) f32 (fwd | bwd hidden states concatenated)."""
    T, B, D = x.shape
    w_ih_f, w_hh_f, b_ih_f, b_hh_f = layer_params["fwd"]
    w_ih_b, w_hh_b, b_ih_b, b_hh_b = layer_params["bwd"]
    H = w_hh_f.shape[1]
    G = 4 * H

    # Stack per-direction parameters; pre-transpose + one-time bf16 cast of weights.
    wih_s = jnp.stack([w_ih_f.T, w_ih_b.T]).astype(jnp.bfloat16)    # (2, D, 4H)
    whh_s = jnp.stack([w_hh_f.T, w_hh_b.T]).astype(jnp.bfloat16)    # (2, H, 4H)
    b_s = jnp.stack([(b_ih_f + b_hh_f).reshape(1, G),
                     (b_ih_b + b_hh_b).reshape(1, G)])              # (2, 1, 4H) f32

    x2d = x.reshape(T * B, D)   # row-major flatten, no data movement

    kernel = functools.partial(_bilstm_layer_kernel, T=T, B=B, H=H)
    out = pl.pallas_call(
        kernel,
        out_shape=jax.ShapeDtypeStruct((2, T * B, H), jnp.float32),
        grid_spec=pltpu.PrefetchScalarGridSpec(
            num_scalar_prefetch=0,
            grid=(2,),                                              # direction axis
            in_specs=[
                pl.BlockSpec((T * B, D), lambda d: (0, 0)),         # shared input
                pl.BlockSpec((None, D, G), lambda d: (d, 0, 0)),    # per-dir W_ih^T
                pl.BlockSpec((None, H, G), lambda d: (d, 0, 0)),    # per-dir W_hh^T
                pl.BlockSpec((None, 1, G), lambda d: (d, 0, 0)),    # per-dir bias
            ],
            out_specs=pl.BlockSpec((None, T * B, H), lambda d: (d, 0, 0)),
            scratch_shapes=[
                pltpu.VMEM((T * B, G), jnp.float32),   # hoisted pre-gates
                pltpu.VMEM((B, H), jnp.float32),       # h
                pltpu.VMEM((B, H), jnp.float32),       # c
            ],
        ),
        # Independent directions: shard across the 2 TensorCores on v7x; on v5e/v6e this
        # is a sequential 2-step grid inside a single kernel launch.
        compiler_params=pltpu.CompilerParams(dimension_semantics=("parallel",)),
    )(x2d, wih_s, whh_s, b_s)

    fwd = out[0].reshape(T, B, H)
    bwd = out[1].reshape(T, B, H)
    return jnp.concatenate([fwd, bwd], axis=-1)


def run_fc(x2d, w_fc, b_fc):
    N, F = x2d.shape
    O = w_fc.shape[0]
    O_pad = max(128, pl.cdiv(O, 128) * 128)     # lane-dense output, sliced below
    w_p = jnp.zeros((F, O_pad), jnp.bfloat16).at[:, :O].set(w_fc.T.astype(jnp.bfloat16))
    b_p = jnp.zeros((1, O_pad), jnp.float32).at[:, :O].set(b_fc.reshape(1, O))
    out = pl.pallas_call(
        _fc_kernel,
        out_shape=jax.ShapeDtypeStruct((N, O_pad), jnp.float32),
        in_specs=[pl.BlockSpec(memory_space=pltpu.MemorySpace.VMEM)] * 3,
        out_specs=pl.BlockSpec(memory_space=pltpu.MemorySpace.VMEM),
    )(x2d, w_p, b_p)
    return out[:, :O]


def bilstm_forward(params, text):
    """BiLSTM.forward with input_rep=0 (no extra case features), eval mode."""
    # embedding lookup (padding_idx row of the table is zero) -- glue, plain JAX
    emb = jnp.take(params["embedding"], text, axis=0)        # (T, B, E)
    # self.dropout(...) is identity in eval mode.
    # TODO(synk): input_rep==1 path concatenates torchtext-vocab-derived case
    # features; requires an external vocab object, not implemented here.
    layer_in = emb
    for l in range(params["n_layers"]):
        layer_in = run_bilstm_layer(layer_in, params["lstm"][l])   # (T, B, 2H)
    T, B, F = layer_in.shape
    out = run_fc(layer_in.reshape(T * B, F), params["fc_w"], params["fc_b"])
    return out.reshape(T, B, -1)


# ------------------------------------------------------------------ params / reference

def init_params(key, vocab, emb_dim, hidden, out_dim, n_layers, pad_idx):
    keys = iter(jax.random.split(key, 1 + 8 * n_layers + 2))
    emb = 0.1 * jax.random.normal(next(keys), (vocab, emb_dim), jnp.float32)
    emb = emb.at[pad_idx].set(0.0)                            # nn.Embedding(padding_idx=pad_idx)
    lstm = []
    for l in range(n_layers):
        in_size = emb_dim if l == 0 else 2 * hidden
        layer = {}
        for d in ("fwd", "bwd"):
            w_ih = 0.1 * jax.random.normal(next(keys), (4 * hidden, in_size), jnp.float32)
            w_hh = 0.1 * jax.random.normal(next(keys), (4 * hidden, hidden), jnp.float32)
            b_ih = 0.1 * jax.random.normal(next(keys), (4 * hidden,), jnp.float32)
            b_hh = 0.1 * jax.random.normal(next(keys), (4 * hidden,), jnp.float32)
            layer[d] = (w_ih, w_hh, b_ih, b_hh)
        lstm.append(layer)
    fc_w = 0.1 * jax.random.normal(next(keys), (out_dim, 2 * hidden), jnp.float32)
    fc_b = 0.1 * jax.random.normal(next(keys), (out_dim,), jnp.float32)
    return {"embedding": emb, "lstm": lstm, "fc_w": fc_w, "fc_b": fc_b,
            "n_layers": n_layers}


def reference_forward(params, text):
    """Pure-JAX f32 reference matching PyTorch BiLSTM eval-mode forward."""
    emb = jnp.take(params["embedding"], text, axis=0)

    def lstm_dir(x, w_ih, w_hh, b_ih, b_hh):
        T, B, _ = x.shape
        H = w_hh.shape[1]

        def step(carry, x_t):
            h, c = carry
            gates = x_t @ w_ih.T + h @ w_hh.T + b_ih + b_hh
            i = jax.nn.sigmoid(gates[:, 0:H])
            f = jax.nn.sigmoid(gates[:, H:2 * H])
            g = jnp.tanh(gates[:, 2 * H:3 * H])
            o = jax.nn.sigmoid(gates[:, 3 * H:4 * H])
            c = f * c + i * g
            h = o * jnp.tanh(c)
            return (h, c), h

        init = (jnp.zeros((B, H), jnp.float32), jnp.zeros((B, H), jnp.float32))
        _, hs = lax.scan(step, init, x)
        return hs

    layer_in = emb
    for l in range(params["n_layers"]):
        fwd = lstm_dir(layer_in, *params["lstm"][l]["fwd"])
        bwd = lstm_dir(layer_in[::-1], *params["lstm"][l]["bwd"])[::-1]
        layer_in = jnp.concatenate([fwd, bwd], axis=-1)
    return layer_in @ params["fc_w"].T + params["fc_b"]


# ------------------------------------------------------------------ main

if __name__ == "__main__":
    VOCAB, EMB_DIM, HIDDEN, OUT_DIM = 50, 32, 32, 8
    N_LAYERS, PAD_IDX = 2, 0
    SEQ_LEN, BATCH = 8, 2

    key = jax.random.PRNGKey(0)
    pkey, tkey = jax.random.split(key)
    params = init_params(pkey, VOCAB, EMB_DIM, HIDDEN, OUT_DIM, N_LAYERS, PAD_IDX)
    text = jax.random.randint(tkey, (SEQ_LEN, BATCH), 0, VOCAB, dtype=jnp.int32)

    preds = bilstm_forward(params, text)
    preds = jax.block_until_ready(preds)

    assert preds.shape == (SEQ_LEN, BATCH, OUT_DIM)
    ref = reference_forward(params, text)
    # Kernel uses bf16 MXU operands (f32 accumulation / gate math); compare against the
    # f32 reference with a tolerance that comfortably covers bf16 rounding (~1e-3 abs).
    np.testing.assert_allclose(np.asarray(preds), np.asarray(ref), rtol=1e-2, atol=1e-2)

    print("KERNEL_OK")
</pallas_src>

<mosaic_0001>
module attributes {stable_mosaic.version = 11 : i64} {
  func.func @_bilstm_layer_kernel(%arg0: i32, %arg1: memref<16x32xf32, #tpu.memory_space<vmem>>, %arg2: memref<1x32x128xbf16, #tpu.memory_space<vmem>>, %arg3: memref<1x32x128xbf16, #tpu.memory_space<vmem>>, %arg4: memref<1x1x128xf32, #tpu.memory_space<vmem>>, %arg5: memref<1x16x32xf32, #tpu.memory_space<vmem>>, %arg6: memref<16x128xf32, #tpu.memory_space<vmem>>, %arg7: memref<2x32xf32, #tpu.memory_space<vmem>>, %arg8: memref<2x32xf32, #tpu.memory_space<vmem>>) attributes {dimension_semantics = [#tpu.dimension_semantics<parallel>], iteration_bounds = array<i64: 2>, scalar_prefetch = 0 : i64, scratch_operands = 3 : i64, tpu.core_type = #tpu.core_type<tc>, window_params = [{pipeline_mode = #tpu.pipeline_mode<synchronous>, transform_indices = @transform_0, window_bounds = array<i64: 16, 32>}, {transform_indices = @transform_1, window_bounds = array<i64: 1, 32, 128>}, {transform_indices = @transform_2, window_bounds = array<i64: 1, 32, 128>}, {transform_indices = @transform_3, window_bounds = array<i64: 1, 1, 128>}, {transform_indices = @transform_4, window_bounds = array<i64: 1, 16, 32>}]} {
    %c0 = arith.constant 0 : index
    %c0_0 = arith.constant 0 : index
    %0 = vector.load %arg1[%c0, %c0_0] : memref<16x32xf32, #tpu.memory_space<vmem>>, vector<16x32xf32>
    %1 = arith.truncf %0 : vector<16x32xf32> to vector<16x32xbf16>
    %c0_1 = arith.constant 0 : index
    %c0_2 = arith.constant 0 : index
    %c0_3 = arith.constant 0 : index
    %2 = vector.load %arg2[%c0_1, %c0_2, %c0_3] : memref<1x32x128xbf16, #tpu.memory_space<vmem>>, vector<1x32x128xbf16>
    %3 = vector.shape_cast %2 : vector<1x32x128xbf16> to vector<32x128xbf16>
    %cst = arith.constant dense<0.000000e+00> : vector<16x128xf32>
    %4 = tpu.matmul %1, %3, %cst {dimension_numbers = #tpu.dot_dimension_numbers<[1], [0], [0], [1], [0, 0, 1, 1], [], []>} : vector<16x32xbf16>, vector<32x128xbf16>, vector<16x128xf32> -> vector<16x128xf32>
    %c0_4 = arith.constant 0 : index
    %c0_5 = arith.constant 0 : index
    %c0_6 = arith.constant 0 : index
    %5 = vector.load %arg4[%c0_4, %c0_5, %c0_6] : memref<1x1x128xf32, #tpu.memory_space<vmem>>, vector<1x1x128xf32>
    %6 = vector.shape_cast %5 : vector<1x1x128xf32> to vector<1x128xf32>
    %7 = vector.broadcast %6 : vector<1x128xf32> to vector<16x128xf32>
    %8 = arith.addf %4, %7 : vector<16x128xf32>
    %c0_7 = arith.constant 0 : index
    %c0_8 = arith.constant 0 : index
    %9 = vector.load %arg6[%c0_7, %c0_8] : memref<16x128xf32, #tpu.memory_space<vmem>>, vector<16x128xf32>
    tpu.vector_store %arg6[%c0_7, %c0_8], %8 {strides = array<i32>} : memref<16x128xf32, #tpu.memory_space<vmem>>, vector<16x128xf32>,
    %cst_9 = arith.constant 0.000000e+00 : f32
    %10 = vector.broadcast %cst_9 : f32 to vector<2x32xf32>
    %c0_10 = arith.constant 0 : index
    %c0_11 = arith.constant 0 : index
    %11 = vector.load %arg7[%c0_10, %c0_11] : memref<2x32xf32, #tpu.memory_space<vmem>>, vector<2x32xf32>
    tpu.vector_store %arg7[%c0_10, %c0_11], %10 {strides = array<i32>} : memref<2x32xf32, #tpu.memory_space<vmem>>, vector<2x32xf32>,
    %cst_12 = arith.constant 0.000000e+00 : f32
    %12 = vector.broadcast %cst_12 : f32 to vector<2x32xf32>
    %c0_13 = arith.constant 0 : index
    %c0_14 = arith.constant 0 : index
    %13 = vector.load %arg8[%c0_13, %c0_14] : memref<2x32xf32, #tpu.memory_space<vmem>>, vector<2x32xf32>
    tpu.vector_store %arg8[%c0_13, %c0_14], %12 {strides = array<i32>} : memref<2x32xf32, #tpu.memory_space<vmem>>, vector<2x32xf32>,
    %14 = tpu.iota {dimensions = array<i32: 1>} : vector<2x128xi32>
    %c64_i32 = arith.constant 64 : i32
    %15 = vector.broadcast %c64_i32 : i32 to vector<2x128xi32>
    %16 = arith.cmpi sge, %14, %15 : vector<2x128xi32>
    %c96_i32 = arith.constant 96 : i32
    %17 = vector.broadcast %c96_i32 : i32 to vector<2x128xi32>
    %18 = arith.cmpi slt, %14, %17 : vector<2x128xi32>
    %19 = arith.andi %16, %18 : vector<2x128xi1>
    %c0_i32 = arith.constant 0 : i32
    %c0_i32_15 = arith.constant 0 : i32
    %20 = arith.cmpi eq, %arg0, %c0_i32_15 : i32
    %c7_i32 = arith.constant 7 : i32
    %21 = arith.subi %c7_i32, %c0_i32 : i32
    %22 = arith.select %20, %c0_i32, %21 : i32
    %c2_i32 = arith.constant 2 : i32
    %23 = arith.muli %22, %c2_i32 : i32
    %24 = tpu.assume_multiple %23, 2 : i32
    %25 = arith.index_cast %24 : i32 to index
    %c0_16 = arith.constant 0 : index
    %26 = vector.load %arg6[%25, %c0_16] : memref<16x128xf32, #tpu.memory_space<vmem>>, vector<2x128xf32>
    %c0_17 = arith.constant 0 : index
    %c0_18 = arith.constant 0 : index
    %27 = vector.load %arg7[%c0_17, %c0_18] : memref<2x32xf32, #tpu.memory_space<vmem>>, vector<2x32xf32>
    %28 = arith.truncf %27 : vector<2x32xf32> to vector<2x32xbf16>
    %c0_19 = arith.constant 0 : index
    %c0_20 = arith.constant 0 : index
    %c0_21 = arith.constant 0 : index
    %29 = vector.load %arg3[%c0_19, %c0_20, %c0_21] : memref<1x32x128xbf16, #tpu.memory_space<vmem>>, vector<1x32x128xbf16>
    %30 = vector.shape_cast %29 : vector<1x32x128xbf16> to vector<32x128xbf16>
    %cst_22 = arith.constant dense<0.000000e+00> : vector<2x128xf32>
    %31 = tpu.matmul %28, %30, %cst_22 {dimension_numbers = #tpu.dot_dimension_numbers<[1], [0], [0], [1], [0, 0, 1, 1], [], []>} : vector<2x32xbf16>, vector<32x128xbf16>, vector<2x128xf32> -> vector<2x128xf32>
    %32 = arith.addf %26, %31 : vector<2x128xf32>
    %33 = math.tanh %32 : vector<2x128xf32>
    %34 = arith.negf %32 : vector<2x128xf32>
    %35 = math.exp %34 : vector<2x128xf32>
    %cst_23 = arith.constant 1.000000e+00 : f32
    %36 = vector.broadcast %cst_23 : f32 to vector<2x128xf32>
    %37 = arith.addf %36, %35 : vector<2x128xf32>
    %38 = arith.divf %36, %37 : vector<2x128xf32>
    %39 = arith.select %19, %33, %38 : vector<2x128xi1>, vector<2x128xf32>
    %40 = vector.extract_strided_slice %39 {offsets = [0, 0], sizes = [2, 32], strides = [1, 1]} : vector<2x128xf32> to vector<2x32xf32>
    %41 = vector.extract_strided_slice %39 {offsets = [0, 32], sizes = [2, 32], strides = [1, 1]} : vector<2x128xf32> to vector<2x32xf32>
    %42 = vector.extract_strided_slice %39 {offsets = [0, 64], sizes = [2, 32], strides = [1, 1]} : vector<2x128xf32> to vector<2x32xf32>
    %43 = vector.extract_strided_slice %39 {offsets = [0, 96], sizes = [2, 32], strides = [1, 1]} : vector<2x128xf32> to vector<2x32xf32>
    %c0_24 = arith.constant 0 : index
    %c0_25 = arith.constant 0 : index
    %44 = vector.load %arg8[%c0_24, %c0_25] : memref<2x32xf32, #tpu.memory_space<vmem>>, vector<2x32xf32>
    %45 = arith.mulf %41, %44 : vector<2x32xf32>
    %46 = arith.mulf %40, %42 : vector<2x32xf32>
    %47 = arith.addf %45, %46 : vector<2x32xf32>
    %48 = math.tanh %47 : vector<2x32xf32>
    %49 = arith.mulf %43, %48 : vector<2x32xf32>
    %c0_26 = arith.constant 0 : index
    %c0_27 = arith.constant 0 : index
    %50 = vector.load %arg8[%c0_26, %c0_27] : memref<2x32xf32, #tpu.memory_space<vmem>>, vector<2x32xf32>
    tpu.vector_store %arg8[%c0_26, %c0_27], %47 {strides = array<i32>} : memref<2x32xf32, #tpu.memory_space<vmem>>, vector<2x32xf32>,
    %c0_28 = arith.constant 0 : index
    %c0_29 = arith.constant 0 : index
    %51 = vector.load %arg7[%c0_28, %c0_29] : memref<2x32xf32, #tpu.memory_space<vmem>>, vector<2x32xf32>
    tpu.vector_store %arg7[%c0_28, %c0_29], %49 {strides = array<i32>} : memref<2x32xf32, #tpu.memory_space<vmem>>, vector<2x32xf32>,
    %c0_30 = arith.constant 0 : index
    %52 = arith.index_cast %24 : i32 to index
    %c0_31 = arith.constant 0 : index
    %53 = vector.load %arg5[%c0_30, %52, %c0_31] : memref<1x16x32xf32, #tpu.memory_space<vmem>>, vector<1x2x32xf32>
    %54 = vector.shape_cast %53 : vector<1x2x32xf32> to vector<2x32xf32>
    %55 = vector.shape_cast %49 : vector<2x32xf32> to vector<1x2x32xf32>
    tpu.vector_store %arg5[%c0_30, %52, %c0_31], %55 {strides = array<i32>} : memref<1x16x32xf32, #tpu.memory_space<vmem>>, vector<1x2x32xf32>,
    %c1_i32 = arith.constant 1 : i32
    %c0_i32_32 = arith.constant 0 : i32
    %56 = arith.cmpi eq, %arg0, %c0_i32_32 : i32
    %c7_i32_33 = arith.constant 7 : i32
    %57 = arith.subi %c7_i32_33, %c1_i32 : i32
    %58 = arith.select %56, %c1_i32, %57 : i32
    %c2_i32_34 = arith.constant 2 : i32
    %59 = arith.muli %58, %c2_i32_34 : i32
    %60 = tpu.assume_multiple %59, 2 : i32
    %61 = arith.index_cast %60 : i32 to index
    %c0_35 = arith.constant 0 : index
    %62 = vector.load %arg6[%61, %c0_35] : memref<16x128xf32, #tpu.memory_space<vmem>>, vector<2x128xf32>
    %c0_36 = arith.constant 0 : index
    %c0_37 = arith.constant 0 : index
    %63 = vector.load %arg7[%c0_36, %c0_37] : memref<2x32xf32, #tpu.memory_space<vmem>>, vector<2x32xf32>
    %64 = arith.truncf %63 : vector<2x32xf32> to vector<2x32xbf16>
    %c0_38 = arith.constant 0 : index
    %c0_39 = arith.constant 0 : index
    %c0_40 = arith.constant 0 : index
    %65 = vector.load %arg3[%c0_38, %c0_39, %c0_40] : memref<1x32x128xbf16, #tpu.memory_space<vmem>>, vector<1x32x128xbf16>
    %66 = vector.shape_cast %65 : vector<1x32x128xbf16> to vector<32x128xbf16>
    %cst_41 = arith.constant dense<0.000000e+00> : vector<2x128xf32>
    %67 = tpu.matmul %64, %66, %cst_41 {dimension_numbers = #tpu.dot_dimension_numbers<[1], [0], [0], [1], [0, 0, 1, 1], [], []>} : vector<2x32xbf16>, vector<32x128xbf16>, vector<2x128xf32> -> vector<2x128xf32>
    %68 = arith.addf %62, %67 : vector<2x128xf32>
    %69 = math.tanh %68 : vector<2x128xf32>
    %70 = arith.negf %68 : vector<2x128xf32>
    %71 = math.exp %70 : vector<2x128xf32>
    %cst_42 = arith.constant 1.000000e+00 : f32
    %72 = vector.broadcast %cst_42 : f32 to vector<2x128xf32>
    %73 = arith.addf %72, %71 : vector<2x128xf32>
    %74 = arith.divf %72, %73 : vector<2x128xf32>
    %75 = arith.select %19, %69, %74 : vector<2x128xi1>, vector<2x128xf32>
    %76 = vector.extract_strided_slice %75 {offsets = [0, 0], sizes = [2, 32], strides = [1, 1]} : vector<2x128xf32> to vector<2x32xf32>
    %77 = vector.extract_strided_slice %75 {offsets = [0, 32], sizes = [2, 32], strides = [1, 1]} : vector<2x128xf32> to vector<2x32xf32>
    %78 = vector.extract_strided_slice %75 {offsets = [0, 64], sizes = [2, 32], strides = [1, 1]} : vector<2x128xf32> to vector<2x32xf32>
    %79 = vector.extract_strided_slice %75 {offsets = [0, 96], sizes = [2, 32], strides = [1, 1]} : vector<2x128xf32> to vector<2x32xf32>
    %c0_43 = arith.constant 0 : index
    %c0_44 = arith.constant 0 : index
    %80 = vector.load %arg8[%c0_43, %c0_44] : memref<2x32xf32, #tpu.memory_space<vmem>>, vector<2x32xf32>
    %81 = arith.mulf %77, %80 : vector<2x32xf32>
    %82 = arith.mulf %76, %78 : vector<2x32xf32>
    %83 = arith.addf %81, %82 : vector<2x32xf32>
    %84 = math.tanh %83 : vector<2x32xf32>
    %85 = arith.mulf %79, %84 : vector<2x32xf32>
    %c0_45 = arith.constant 0 : index
    %c0_46 = arith.constant 0 : index
    %86 = vector.load %arg8[%c0_45, %c0_46] : memref<2x32xf32, #tpu.memory_space<vmem>>, vector<2x32xf32>
    tpu.vector_store %arg8[%c0_45, %c0_46], %83 {strides = array<i32>} : memref<2x32xf32, #tpu.memory_space<vmem>>, vector<2x32xf32>,
    %c0_47 = arith.constant 0 : index
    %c0_48 = arith.constant 0 : index
    %87 = vector.load %arg7[%c0_47, %c0_48] : memref<2x32xf32, #tpu.memory_space<vmem>>, vector<2x32xf32>
    tpu.vector_store %arg7[%c0_47, %c0_48], %85 {strides = array<i32>} : memref<2x32xf32, #tpu.memory_space<vmem>>, vector<2x32xf32>,
    %c0_49 = arith.constant 0 : index
    %88 = arith.index_cast %60 : i32 to index
    %c0_50 = arith.constant 0 : index
    %89 = vector.load %arg5[%c0_49, %88, %c0_50] : memref<1x16x32xf32, #tpu.memory_space<vmem>>, vector<1x2x32xf32>
    %90 = vector.shape_cast %89 : vector<1x2x32xf32> to vector<2x32xf32>
    %91 = vector.shape_cast %85 : vector<2x32xf32> to vector<1x2x32xf32>
    tpu.vector_store %arg5[%c0_49, %88, %c0_50], %91 {strides = array<i32>} : memref<1x16x32xf32, #tpu.memory_space<vmem>>, vector<1x2x32xf32>,
    %c2_i32_51 = arith.constant 2 : i32
    %c0_i32_52 = arith.constant 0 : i32
    %92 = arith.cmpi eq, %arg0, %c0_i32_52 : i32
    %c7_i32_53 = arith.constant 7 : i32
    %93 = arith.subi %c7_i32_53, %c2_i32_51 : i32
    %94 = arith.select %92, %c2_i32_51, %93 : i32
    %c2_i32_54 = arith.constant 2 : i32
    %95 = arith.muli %94, %c2_i32_54 : i32
    %96 = tpu.assume_multiple %95, 2 : i32
    %97 = arith.index_cast %96 : i32 to index
    %c0_55 = arith.constant 0 : index
    %98 = vector.load %arg6[%97, %c0_55] : memref<16x128xf32, #tpu.memory_space<vmem>>, vector<2x128xf32>
    %c0_56 = arith.constant 0 : index
    %c0_57 = arith.constant 0 : index
    %99 = vector.load %arg7[%c0_56, %c0_57] : memref<2x32xf32, #tpu.memory_space<vmem>>, vector<2x32xf32>
    %100 = arith.truncf %99 : vector<2x32xf32> to vector<2x32xbf16>
    %c0_58 = arith.constant 0 : index
    %c0_59 = arith.constant 0 : index
    %c0_60 = arith.constant 0 : index
    %101 = vector.load %arg3[%c0_58, %c0_59, %c0_60] : memref<1x32x128xbf16, #tpu.memory_space<vmem>>, vector<1x32x128xbf16>
    %102 = vector.shape_cast %101 : vector<1x32x128xbf16> to vector<32x128xbf16>
    %cst_61 = arith.constant dense<0.000000e+00> : vector<2x128xf32>
    %103 = tpu.matmul %100, %102, %cst_61 {dimension_numbers = #tpu.dot_dimension_numbers<[1], [0], [0], [1], [0, 0, 1, 1], [], []>} : vector<2x32xbf16>, vector<32x128xbf16>, vector<2x128xf32> -> vector<2x128xf32>
    %104 = arith.addf %98, %103 : vector<2x128xf32>
    %105 = math.tanh %104 : vector<2x128xf32>
    %106 = arith.negf %104 : vector<2x128xf32>
    %107 = math.exp %106 : vector<2x128xf32>
    %cst_62 = arith.constant 1.000000e+00 : f32
    %108 = vector.broadcast %cst_62 : f32 to vector<2x128xf32>
    %109 = arith.addf %108, %107 : vector<2x128xf32>
    %110 = arith.divf %108, %109 : vector<2x128xf32>
    %111 = arith.select %19, %105, %110 : vector<2x128xi1>, vector<2x128xf32>
    %112 = vector.extract_strided_slice %111 {offsets = [0, 0], sizes = [2, 32], strides = [1, 1]} : vector<2x128xf32> to vector<2x32xf32>
    %113 = vector.extract_strided_slice %111 {offsets = [0, 32], sizes = [2, 32], strides = [1, 1]} : vector<2x128xf32> to vector<2x32xf32>
    %114 = vector.extract_strided_slice %111 {offsets = [0, 64], sizes = [2, 32], strides = [1, 1]} : vector<2x128xf32> to vector<2x32xf32>
    %115 = vector.extract_strided_slice %111 {offsets = [0, 96], sizes = [2, 32], strides = [1, 1]} : vector<2x128xf32> to vector<2x32xf32>
    %c0_63 = arith.constant 0 : index
    %c0_64 = arith.constant 0 : index
    %116 = vector.load %arg8[%c0_63, %c0_64] : memref<2x32xf32, #tpu.memory_space<vmem>>, vector<2x32xf32>
    %117 = arith.mulf %113, %116 : vector<2x32xf32>
    %118 = arith.mulf %112, %114 : vector<2x32xf32>
    %119 = arith.addf %117, %118 : vector<2x32xf32>
    %120 = math.tanh %119 : vector<2x32xf32>
    %121 = arith.mulf %115, %120 : vector<2x32xf32>
    %c0_65 = arith.constant 0 : index
    %c0_66 = arith.constant 0 : index
    %122 = vector.load %arg8[%c0_65, %c0_66] : memref<2x32xf32, #tpu.memory_space<vmem>>, vector<2x32xf32>
    tpu.vector_store %arg8[%c0_65, %c0_66], %119 {strides = array<i32>} : memref<2x32xf32, #tpu.memory_space<vmem>>, vector<2x32xf32>,
    %c0_67 = arith.constant 0 : index
    %c0_68 = arith.constant 0 : index
    %123 = vector.load %arg7[%c0_67, %c0_68] : memref<2x32xf32, #tpu.memory_space<vmem>>, vector<2x32xf32>
    tpu.vector_store %arg7[%c0_67, %c0_68], %121 {strides = array<i32>} : memref<2x32xf32, #tpu.memory_space<vmem>>, vector<2x32xf32>,
    %c0_69 = arith.constant 0 : index
    %124 = arith.index_cast %96 : i32 to index
    %c0_70 = arith.constant 0 : index
    %125 = vector.load %arg5[%c0_69, %124, %c0_70] : memref<1x16x32xf32, #tpu.memory_space<vmem>>, vector<1x2x32xf32>
    %126 = vector.shape_cast %125 : vector<1x2x32xf32> to vector<2x32xf32>
    %127 = vector.shape_cast %121 : vector<2x32xf32> to vector<1x2x32xf32>
    tpu.vector_store %arg5[%c0_69, %124, %c0_70], %127 {strides = array<i32>} : memref<1x16x32xf32, #tpu.memory_space<vmem>>, vector<1x2x32xf32>,
    %c3_i32 = arith.constant 3 : i32
    %c0_i32_71 = arith.constant 0 : i32
    %128 = arith.cmpi eq, %arg0, %c0_i32_71 : i32
    %c7_i32_72 = arith.constant 7 : i32
    %129 = arith.subi %c7_i32_72, %c3_i32 : i32
    %130 = arith.select %128, %c3_i32, %129 : i32
    %c2_i32_73 = arith.constant 2 : i32
    %131 = arith.muli %130, %c2_i32_73 : i32
    %132 = tpu.assume_multiple %131, 2 : i32
    %133 = arith.index_cast %132 : i32 to index
    %c0_74 = arith.constant 0 : index
    %134 = vector.load %arg6[%133, %c0_74] : memref<16x128xf32, #tpu.memory_space<vmem>>, vector<2x128xf32>
    %c0_75 = arith.constant 0 : index
    %c0_76 = arith.constant 0 : index
    %135 = vector.load %arg7[%c0_75, %c0_76] : memref<2x32xf32, #tpu.memory_space<vmem>>, vector<2x32xf32>
    %136 = arith.truncf %135 : vector<2x32xf32> to vector<2x32xbf16>
    %c0_77 = arith.constant 0 : index
    %c0_78 = arith.constant 0 : index
    %c0_79 = arith.constant 0 : index
    %137 = vector.load %arg3[%c0_77, %c0_78, %c0_79] : memref<1x32x128xbf16, #tpu.memory_space<vmem>>, vector<1x32x128xbf16>
    %138 = vector.shape_cast %137 : vector<1x32x128xbf16> to vector<32x128xbf16>
    %cst_80 = arith.constant dense<0.000000e+00> : vector<2x128xf32>
    %139 = tpu.matmul %136, %138, %cst_80 {dimension_numbers = #tpu.dot_dimension_numbers<[1], [0], [0], [1], [0, 0, 1, 1], [], []>} : vector<2x32xbf16>, vector<32x128xbf16>, vector<2x128xf32> -> vector<2x128xf32>
    %140 = arith.addf %134, %139 : vector<2x128xf32>
    %141 = math.tanh %140 : vector<2x128xf32>
    %142 = arith.negf %140 : vector<2x128xf32>
    %143 = math.exp %142 : vector<2x128xf32>
    %cst_81 = arith.constant 1.000000e+00 : f32
    %144 = vector.broadcast %cst_81 : f32 to vector<2x128xf32>
    %145 = arith.addf %144, %143 : vector<2x128xf32>
    %146 = arith.divf %144, %145 : vector<2x128xf32>
    %147 = arith.select %19, %141, %146 : vector<2x128xi1>, vector<2x128xf32>
    %148 = vector.extract_strided_slice %147 {offsets = [0, 0], sizes = [2, 32], strides = [1, 1]} : vector<2x128xf32> to vector<2x32xf32>
    %149 = vector.extract_strided_slice %147 {offsets = [0, 32], sizes = [2, 32], strides = [1, 1]} : vector<2x128xf32> to vector<2x32xf32>
    %150 = vector.extract_strided_slice %147 {offsets = [0, 64], sizes = [2, 32], strides = [1, 1]} : vector<2x128xf32> to vector<2x32xf32>
    %151 = vector.extract_strided_slice %147 {offsets = [0, 96], sizes = [2, 32], strides = [1, 1]} : vector<2x128xf32> to vector<2x32xf32>
    %c0_82 = arith.constant 0 : index
    %c0_83 = arith.constant 0 : index
    %152 = vector.load %arg8[%c0_82, %c0_83] : memref<2x32xf32, #tpu.memory_space<vmem>>, vector<2x32xf32>
    %153 = arith.mulf %149, %152 : vector<2x32xf32>
    %154 = arith.mulf %148, %150 : vector<2x32xf32>
    %155 = arith.addf %153, %154 : vector<2x32xf32>
    %156 = math.tanh %155 : vector<2x32xf32>
    %157 = arith.mulf %151, %156 : vector<2x32xf32>
    %c0_84 = arith.constant 0 : index
    %c0_85 = arith.constant 0 : index
    %158 = vector.load %arg8[%c0_84, %c0_85] : memref<2x32xf32, #tpu.memory_space<vmem>>, vector<2x32xf32>
    tpu.vector_store %arg8[%c0_84, %c0_85], %155 {strides = array<i32>} : memref<2x32xf32, #tpu.memory_space<vmem>>, vector<2x32xf32>,
    %c0_86 = arith.constant 0 : index
    %c0_87 = arith.constant 0 : index
    %159 = vector.load %arg7[%c0_86, %c0_87] : memref<2x32xf32, #tpu.memory_space<vmem>>, vector<2x32xf32>
    tpu.vector_store %arg7[%c0_86, %c0_87], %157 {strides = array<i32>} : memref<2x32xf32, #tpu.memory_space<vmem>>, vector<2x32xf32>,
    %c0_88 = arith.constant 0 : index
    %160 = arith.index_cast %132 : i32 to index
    %c0_89 = arith.constant 0 : index
    %161 = vector.load %arg5[%c0_88, %160, %c0_89] : memref<1x16x32xf32, #tpu.memory_space<vmem>>, vector<1x2x32xf32>
    %162 = vector.shape_cast %161 : vector<1x2x32xf32> to vector<2x32xf32>
    %163 = vector.shape_cast %157 : vector<2x32xf32> to vector<1x2x32xf32>
    tpu.vector_store %arg5[%c0_88, %160, %c0_89], %163 {strides = array<i32>} : memref<1x16x32xf32, #tpu.memory_space<vmem>>, vector<1x2x32xf32>,
    %c4_i32 = arith.constant 4 : i32
    %c0_i32_90 = arith.constant 0 : i32
    %164 = arith.cmpi eq, %arg0, %c0_i32_90 : i32
    %c7_i32_91 = arith.constant 7 : i32
    %165 = arith.subi %c7_i32_91, %c4_i32 : i32
    %166 = arith.select %164, %c4_i32, %165 : i32
    %c2_i32_92 = arith.constant 2 : i32
    %167 = arith.muli %166, %c2_i32_92 : i32
    %168 = tpu.assume_multiple %167, 2 : i32
    %169 = arith.index_cast %168 : i32 to index
    %c0_93 = arith.constant 0 : index
    %170 = vector.load %arg6[%169, %c0_93] : memref<16x128xf32, #tpu.memory_space<vmem>>, vector<2x128xf32>
    %c0_94 = arith.constant 0 : index
    %c0_95 = arith.constant 0 : index
    %171 = vector.load %arg7[%c0_94, %c0_95] : memref<2x32xf32, #tpu.memory_space<vmem>>, vector<2x32xf32>
    %172 = arith.truncf %171 : vector<2x32xf32> to vector<2x32xbf16>
    %c0_96 = arith.constant 0 : index
    %c0_97 = arith.constant 0 : index
    %c0_98 = arith.constant 0 : index
    %173 = vector.load %arg3[%c0_96, %c0_97, %c0_98] : memref<1x32x128xbf16, #tpu.memory_space<vmem>>, vector<1x32x128xbf16>
    %174 = vector.shape_cast %173 : vector<1x32x128xbf16> to vector<32x128xbf16>
    %cst_99 = arith.constant dense<0.000000e+00> : vector<2x128xf32>
    %175 = tpu.matmul %172, %174, %cst_99 {dimension_numbers = #tpu.dot_dimension_numbers<[1], [0], [0], [1], [0, 0, 1, 1], [], []>} : vector<2x32xbf16>, vector<32x128xbf16>, vector<2x128xf32> -> vector<2x128xf32>
    %176 = arith.addf %170, %175 : vector<2x128xf32>
    %177 = math.tanh %176 : vector<2x128xf32>
    %178 = arith.negf %176 : vector<2x128xf32>
    %179 = math.exp %178 : vector<2x128xf32>
    %cst_100 = arith.constant 1.000000e+00 : f32
    %180 = vector.broadcast %cst_100 : f32 to vector<2x128xf32>
    %181 = arith.addf %180, %179 : vector<2x128xf32>
    %182 = arith.divf %180, %181 : vector<2x128xf32>
    %183 = arith.select %19, %177, %182 : vector<2x128xi1>, vector<2x128xf32>
    %184 = vector.extract_strided_slice %183 {offsets = [0, 0], sizes = [2, 32], strides = [1, 1]} : vector<2x128xf32> to vector<2x32xf32>
    %185 = vector.extract_strided_slice %183 {offsets = [0, 32], sizes = [2, 32], strides = [1, 1]} : vector<2x128xf32> to vector<2x32xf32>
    %186 = vector.extract_strided_slice %183 {offsets = [0, 64], sizes = [2, 32], strides = [1, 1]} : vector<2x128xf32> to vector<2x32xf32>
    %187 = vector.extract_strided_slice %183 {offsets = [0, 96], sizes = [2, 32], strides = [1, 1]} : vector<2x128xf32> to vector<2x32xf32>
    %c0_101 = arith.constant 0 : index
    %c0_102 = arith.constant 0 : index
    %188 = vector.load %arg8[%c0_101, %c0_102] : memref<2x32xf32, #tpu.memory_space<vmem>>, vector<2x32xf32>
    %189 = arith.mulf %185, %188 : vector<2x32xf32>
    %190 = arith.mulf %184, %186 : vector<2x32xf32>
    %191 = arith.addf %189, %190 : vector<2x32xf32>
    %192 = math.tanh %191 : vector<2x32xf32>
    %193 = arith.mulf %187, %192 : vector<2x32xf32>
    %c0_103 = arith.constant 0 : index
    %c0_104 = arith.constant 0 : index
    %194 = vector.load %arg8[%c0_103, %c0_104] : memref<2x32xf32, #tpu.memory_space<vmem>>, vector<2x32xf32>
    tpu.vector_store %arg8[%c0_103, %c0_104], %191 {strides = array<i32>} : memref<2x32xf32, #tpu.memory_space<vmem>>, vector<2x32xf32>,
    %c0_105 = arith.constant 0 : index
    %c0_106 = arith.constant 0 : index
    %195 = vector.load %arg7[%c0_105, %c0_106] : memref<2x32xf32, #tpu.memory_space<vmem>>, vector<2x32xf32>
    tpu.vector_store %arg7[%c0_105, %c0_106], %193 {strides = array<i32>} : memref<2x32xf32, #tpu.memory_space<vmem>>, vector<2x32xf32>,
    %c0_107 = arith.constant 0 : index
    %196 = arith.index_cast %168 : i32 to index
    %c0_108 = arith.constant 0 : index
    %197 = vector.load %arg5[%c0_107, %196, %c0_108] : memref<1x16x32xf32, #tpu.memory_space<vmem>>, vector<1x2x32xf32>
    %198 = vector.shape_cast %197 : vector<1x2x32xf32> to vector<2x32xf32>
    %199 = vector.shape_cast %193 : vector<2x32xf32> to vector<1x2x32xf32>
    tpu.vector_store %arg5[%c0_107, %196, %c0_108], %199 {strides = array<i32>} : memref<1x16x32xf32, #tpu.memory_space<vmem>>, vector<1x2x32xf32>,
    %c5_i32 = arith.constant 5 : i32
    %c0_i32_109 = arith.constant 0 : i32
    %200 = arith.cmpi eq, %arg0, %c0_i32_109 : i32
    %c7_i32_110 = arith.constant 7 : i32
    %201 = arith.subi %c7_i32_110, %c5_i32 : i32
    %202 = arith.select %200, %c5_i32, %201 : i32
    %c2_i32_111 = arith.constant 2 : i32
    %203 = arith.muli %202, %c2_i32_111 : i32
    %204 = tpu.assume_multiple %203, 2 : i32
    %205 = arith.index_cast %204 : i32 to index
    %c0_112 = arith.constant 0 : index
    %206 = vector.load %arg6[%205, %c0_112] : memref<16x128xf32, #tpu.memory_space<vmem>>, vector<2x128xf32>
    %c0_113 = arith.constant 0 : index
    %c0_114 = arith.constant 0 : index
    %207 = vector.load %arg7[%c0_113, %c0_114] : memref<2x32xf32, #tpu.memory_space<vmem>>, vector<2x32xf32>
    %208 = arith.truncf %207 : vector<2x32xf32> to vector<2x32xbf16>
    %c0_115 = arith.constant 0 : index
    %c0_116 = arith.constant 0 : index
    %c0_117 = arith.constant 0 : index
    %209 = vector.load %arg3[%c0_115, %c0_116, %c0_117] : memref<1x32x128xbf16, #tpu.memory_space<vmem>>, vector<1x32x128xbf16>
    %210 = vector.shape_cast %209 : vector<1x32x128xbf16> to vector<32x128xbf16>
    %cst_118 = arith.constant dense<0.000000e+00> : vector<2x128xf32>
    %211 = tpu.matmul %208, %210, %cst_118 {dimension_numbers = #tpu.dot_dimension_numbers<[1], [0], [0], [1], [0, 0, 1, 1], [], []>} : vector<2x32xbf16>, vector<32x128xbf16>, vector<2x128xf32> -> vector<2x128xf32>
    %212 = arith.addf %206, %211 : vector<2x128xf32>
    %213 = math.tanh %212 : vector<2x128xf32>
    %214 = arith.negf %212 : vector<2x128xf32>
    %215 = math.exp %214 : vector<2x128xf32>
    %cst_119 = arith.constant 1.000000e+00 : f32
    %216 = vector.broadcast %cst_119 : f32 to vector<2x128xf32>
    %217 = arith.addf %216, %215 : vector<2x128xf32>
    %218 = arith.divf %216, %217 : vector<2x128xf32>
    %219 = arith.select %19, %213, %218 : vector<2x128xi1>, vector<2x128xf32>
    %220 = vector.extract_strided_slice %219 {offsets = [0, 0], sizes = [2, 32], strides = [1, 1]} : vector<2x128xf32> to vector<2x32xf32>
    %221 = vector.extract_strided_slice %219 {offsets = [0, 32], sizes = [2, 32], strides = [1, 1]} : vector<2x128xf32> to vector<2x32xf32>
    %222 = vector.extract_strided_slice %219 {offsets = [0, 64], sizes = [2, 32], strides = [1, 1]} : vector<2x128xf32> to vector<2x32xf32>
    %223 = vector.extract_strided_slice %219 {offsets = [0, 96], sizes = [2, 32], strides = [1, 1]} : vector<2x128xf32> to vector<2x32xf32>
    %c0_120 = arith.constant 0 : index
    %c0_121 = arith.constant 0 : index
    %224 = vector.load %arg8[%c0_120, %c0_121] : memref<2x32xf32, #tpu.memory_space<vmem>>, vector<2x32xf32>
    %225 = arith.mulf %221, %224 : vector<2x32xf32>
    %226 = arith.mulf %220, %222 : vector<2x32xf32>
    %227 = arith.addf %225, %226 : vector<2x32xf32>
    %228 = math.tanh %227 : vector<2x32xf32>
    %229 = arith.mulf %223, %228 : vector<2x32xf32>
    %c0_122 = arith.constant 0 : index
    %c0_123 = arith.constant 0 : index
    %230 = vector.load %arg8[%c0_122, %c0_123] : memref<2x32xf32, #tpu.memory_space<vmem>>, vector<2x32xf32>
    tpu.vector_store %arg8[%c0_122, %c0_123], %227 {strides = array<i32>} : memref<2x32xf32, #tpu.memory_space<vmem>>, vector<2x32xf32>,
    %c0_124 = arith.constant 0 : index
    %c0_125 = arith.constant 0 : index
    %231 = vector.load %arg7[%c0_124, %c0_125] : memref<2x32xf32, #tpu.memory_space<vmem>>, vector<2x32xf32>
    tpu.vector_store %arg7[%c0_124, %c0_125], %229 {strides = array<i32>} : memref<2x32xf32, #tpu.memory_space<vmem>>, vector<2x32xf32>,
    %c0_126 = arith.constant 0 : index
    %232 = arith.index_cast %204 : i32 to index
    %c0_127 = arith.constant 0 : index
    %233 = vector.load %arg5[%c0_126, %232, %c0_127] : memref<1x16x32xf32, #tpu.memory_space<vmem>>, vector<1x2x32xf32>
    %234 = vector.shape_cast %233 : vector<1x2x32xf32> to vector<2x32xf32>
    %235 = vector.shape_cast %229 : vector<2x32xf32> to vector<1x2x32xf32>
    tpu.vector_store %arg5[%c0_126, %232, %c0_127], %235 {strides = array<i32>} : memref<1x16x32xf32, #tpu.memory_space<vmem>>, vector<1x2x32xf32>,
    %c6_i32 = arith.constant 6 : i32
    %c0_i32_128 = arith.constant 0 : i32
    %236 = arith.cmpi eq, %arg0, %c0_i32_128 : i32
    %c7_i32_129 = arith.constant 7 : i32
    %237 = arith.subi %c7_i32_129, %c6_i32 : i32
    %238 = arith.select %236, %c6_i32, %237 : i32
    %c2_i32_130 = arith.constant 2 : i32
    %239 = arith.muli %238, %c2_i32_130 : i32
    %240 = tpu.assume_multiple %239, 2 : i32
    %241 = arith.index_cast %240 : i32 to index
    %c0_131 = arith.constant 0 : index
    %242 = vector.load %arg6[%241, %c0_131] : memref<16x128xf32, #tpu.memory_space<vmem>>, vector<2x128xf32>
    %c0_132 = arith.constant 0 : index
    %c0_133 = arith.constant 0 : index
    %243 = vector.load %arg7[%c0_132, %c0_133] : memref<2x32xf32, #tpu.memory_space<vmem>>, vector<2x32xf32>
    %244 = arith.truncf %243 : vector<2x32xf32> to vector<2x32xbf16>
    %c0_134 = arith.constant 0 : index
    %c0_135 = arith.constant 0 : index
    %c0_136 = arith.constant 0 : index
    %245 = vector.load %arg3[%c0_134, %c0_135, %c0_136] : memref<1x32x128xbf16, #tpu.memory_space<vmem>>, vector<1x32x128xbf16>
    %246 = vector.shape_cast %245 : vector<1x32x128xbf16> to vector<32x128xbf16>
    %cst_137 = arith.constant dense<0.000000e+00> : vector<2x128xf32>
    %247 = tpu.matmul %244, %246, %cst_137 {dimension_numbers = #tpu.dot_dimension_numbers<[1], [0], [0], [1], [0, 0, 1, 1], [], []>} : vector<2x32xbf16>, vector<32x128xbf16>, vector<2x128xf32> -> vector<2x128xf32>
    %248 = arith.addf %242, %247 : vector<2x128xf32>
    %249 = math.tanh %248 : vector<2x128xf32>
    %250 = arith.negf %248 : vector<2x128xf32>
    %251 = math.exp %250 : vector<2x128xf32>
    %cst_138 = arith.constant 1.000000e+00 : f32
    %252 = vector.broadcast %cst_138 : f32 to vector<2x128xf32>
    %253 = arith.addf %252, %251 : vector<2x128xf32>
    %254 = arith.divf %252, %253 : vector<2x128xf32>
    %255 = arith.select %19, %249, %254 : vector<2x128xi1>, vector<2x128xf32>
    %256 = vector.extract_strided_slice %255 {offsets = [0, 0], sizes = [2, 32], strides = [1, 1]} : vector<2x128xf32> to vector<2x32xf32>
    %257 = vector.extract_strided_slice %255 {offsets = [0, 32], sizes = [2, 32], strides = [1, 1]} : vector<2x128xf32> to vector<2x32xf32>
    %258 = vector.extract_strided_slice %255 {offsets = [0, 64], sizes = [2, 32], strides = [1, 1]} : vector<2x128xf32> to vector<2x32xf32>
    %259 = vector.extract_strided_slice %255 {offsets = [0, 96], sizes = [2, 32], strides = [1, 1]} : vector<2x128xf32> to vector<2x32xf32>
    %c0_139 = arith.constant 0 : index
    %c0_140 = arith.constant 0 : index
    %260 = vector.load %arg8[%c0_139, %c0_140] : memref<2x32xf32, #tpu.memory_space<vmem>>, vector<2x32xf32>
    %261 = arith.mulf %257, %260 : vector<2x32xf32>
    %262 = arith.mulf %256, %258 : vector<2x32xf32>
    %263 = arith.addf %261, %262 : vector<2x32xf32>
    %264 = math.tanh %263 : vector<2x32xf32>
    %265 = arith.mulf %259, %264 : vector<2x32xf32>
    %c0_141 = arith.constant 0 : index
    %c0_142 = arith.constant 0 : index
    %266 = vector.load %arg8[%c0_141, %c0_142] : memref<2x32xf32, #tpu.memory_space<vmem>>, vector<2x32xf32>
    tpu.vector_store %arg8[%c0_141, %c0_142], %263 {strides = array<i32>} : memref<2x32xf32, #tpu.memory_space<vmem>>, vector<2x32xf32>,
    %c0_143 = arith.constant 0 : index
    %c0_144 = arith.constant 0 : index
    %267 = vector.load %arg7[%c0_143, %c0_144] : memref<2x32xf32, #tpu.memory_space<vmem>>, vector<2x32xf32>
    tpu.vector_store %arg7[%c0_143, %c0_144], %265 {strides = array<i32>} : memref<2x32xf32, #tpu.memory_space<vmem>>, vector<2x32xf32>,
    %c0_145 = arith.constant 0 : index
    %268 = arith.index_cast %240 : i32 to index
    %c0_146 = arith.constant 0 : index
    %269 = vector.load %arg5[%c0_145, %268, %c0_146] : memref<1x16x32xf32, #tpu.memory_space<vmem>>, vector<1x2x32xf32>
    %270 = vector.shape_cast %269 : vector<1x2x32xf32> to vector<2x32xf32>
    %271 = vector.shape_cast %265 : vector<2x32xf32> to vector<1x2x32xf32>
    tpu.vector_store %arg5[%c0_145, %268, %c0_146], %271 {strides = array<i32>} : memref<1x16x32xf32, #tpu.memory_space<vmem>>, vector<1x2x32xf32>,
    %c7_i32_147 = arith.constant 7 : i32
    %c0_i32_148 = arith.constant 0 : i32
    %272 = arith.cmpi eq, %arg0, %c0_i32_148 : i32
    %c7_i32_149 = arith.constant 7 : i32
    %273 = arith.subi %c7_i32_149, %c7_i32_147 : i32
    %274 = arith.select %272, %c7_i32_147, %273 : i32
    %c2_i32_150 = arith.constant 2 : i32
    %275 = arith.muli %274, %c2_i32_150 : i32
    %276 = tpu.assume_multiple %275, 2 : i32
    %277 = arith.index_cast %276 : i32 to index
    %c0_151 = arith.constant 0 : index
    %278 = vector.load %arg6[%277, %c0_151] : memref<16x128xf32, #tpu.memory_space<vmem>>, vector<2x128xf32>
    %c0_152 = arith.constant 0 : index
    %c0_153 = arith.constant 0 : index
    %279 = vector.load %arg7[%c0_152, %c0_153] : memref<2x32xf32, #tpu.memory_space<vmem>>, vector<2x32xf32>
    %280 = arith.truncf %279 : vector<2x32xf32> to vector<2x32xbf16>
    %c0_154 = arith.constant 0 : index
    %c0_155 = arith.constant 0 : index
    %c0_156 = arith.constant 0 : index
    %281 = vector.load %arg3[%c0_154, %c0_155, %c0_156] : memref<1x32x128xbf16, #tpu.memory_space<vmem>>, vector<1x32x128xbf16>
    %282 = vector.shape_cast %281 : vector<1x32x128xbf16> to vector<32x128xbf16>
    %cst_157 = arith.constant dense<0.000000e+00> : vector<2x128xf32>
    %283 = tpu.matmul %280, %282, %cst_157 {dimension_numbers = #tpu.dot_dimension_numbers<[1], [0], [0], [1], [0, 0, 1, 1], [], []>} : vector<2x32xbf16>, vector<32x128xbf16>, vector<2x128xf32> -> vector<2x128xf32>
    %284 = arith.addf %278, %283 : vector<2x128xf32>
    %285 = math.tanh %284 : vector<2x128xf32>
    %286 = arith.negf %284 : vector<2x128xf32>
    %287 = math.exp %286 : vector<2x128xf32>
    %cst_158 = arith.constant 1.000000e+00 : f32
    %288 = vector.broadcast %cst_158 : f32 to vector<2x128xf32>
    %289 = arith.addf %288, %287 : vector<2x128xf32>
    %290 = arith.divf %288, %289 : vector<2x128xf32>
    %291 = arith.select %19, %285, %290 : vector<2x128xi1>, vector<2x128xf32>
    %292 = vector.extract_strided_slice %291 {offsets = [0, 0], sizes = [2, 32], strides = [1, 1]} : vector<2x128xf32> to vector<2x32xf32>
    %293 = vector.extract_strided_slice %291 {offsets = [0, 32], sizes = [2, 32], strides = [1, 1]} : vector<2x128xf32> to vector<2x32xf32>
    %294 = vector.extract_strided_slice %291 {offsets = [0, 64], sizes = [2, 32], strides = [1, 1]} : vector<2x128xf32> to vector<2x32xf32>
    %295 = vector.extract_strided_slice %291 {offsets = [0, 96], sizes = [2, 32], strides = [1, 1]} : vector<2x128xf32> to vector<2x32xf32>
    %c0_159 = arith.constant 0 : index
    %c0_160 = arith.constant 0 : index
    %296 = vector.load %arg8[%c0_159, %c0_160] : memref<2x32xf32, #tpu.memory_space<vmem>>, vector<2x32xf32>
    %297 = arith.mulf %293, %296 : vector<2x32xf32>
    %298 = arith.mulf %292, %294 : vector<2x32xf32>
    %299 = arith.addf %297, %298 : vector<2x32xf32>
    %300 = math.tanh %299 : vector<2x32xf32>
    %301 = arith.mulf %295, %300 : vector<2x32xf32>
    %c0_161 = arith.constant 0 : index
    %c0_162 = arith.constant 0 : index
    %302 = vector.load %arg8[%c0_161, %c0_162] : memref<2x32xf32, #tpu.memory_space<vmem>>, vector<2x32xf32>
    tpu.vector_store %arg8[%c0_161, %c0_162], %299 {strides = array<i32>} : memref<2x32xf32, #tpu.memory_space<vmem>>, vector<2x32xf32>,
    %c0_163 = arith.constant 0 : index
    %c0_164 = arith.constant 0 : index
    %303 = vector.load %arg7[%c0_163, %c0_164] : memref<2x32xf32, #tpu.memory_space<vmem>>, vector<2x32xf32>
    tpu.vector_store %arg7[%c0_163, %c0_164], %301 {strides = array<i32>} : memref<2x32xf32, #tpu.memory_space<vmem>>, vector<2x32xf32>,
    %c0_165 = arith.constant 0 : index
    %304 = arith.index_cast %276 : i32 to index
    %c0_166 = arith.constant 0 : index
    %305 = vector.load %arg5[%c0_165, %304, %c0_166] : memref<1x16x32xf32, #tpu.memory_space<vmem>>, vector<1x2x32xf32>
    %306 = vector.shape_cast %305 : vector<1x2x32xf32> to vector<2x32xf32>
    %307 = vector.shape_cast %301 : vector<2x32xf32> to vector<1x2x32xf32>
    tpu.vector_store %arg5[%c0_165, %304, %c0_166], %307 {strides = array<i32>} : memref<1x16x32xf32, #tpu.memory_space<vmem>>, vector<1x2x32xf32>,
    %c8_i32 = arith.constant 8 : i32
    return
  }
  func.func @transform_0(%arg0: i32) -> (i32, i32) {
    %c0_i32 = arith.constant 0 : i32
    %c0_i32_0 = arith.constant 0 : i32
    %c0_i32_1 = arith.constant 0 : i32
    return %c0_i32, %c0_i32_0 : i32, i32
  }
  func.func @transform_1(%arg0: i32) -> (i32, i32, i32) {
    %c0_i32 = arith.constant 0 : i32
    %c0_i32_0 = arith.constant 0 : i32
    %c0_i32_1 = arith.constant 0 : i32
    return %arg0, %c0_i32, %c0_i32_0 : i32, i32, i32
  }
  func.func @transform_2(%arg0: i32) -> (i32, i32, i32) {
    %c0_i32 = arith.constant 0 : i32
    %c0_i32_0 = arith.constant 0 : i32
    %c0_i32_1 = arith.constant 0 : i32
    return %arg0, %c0_i32, %c0_i32_0 : i32, i32, i32
  }
  func.func @transform_3(%arg0: i32) -> (i32, i32, i32) {
    %c0_i32 = arith.constant 0 : i32
    %c0_i32_0 = arith.constant 0 : i32
    %c0_i32_1 = arith.constant 0 : i32
    return %arg0, %c0_i32, %c0_i32_0 : i32, i32, i32
  }
  func.func @transform_4(%arg0: i32) -> (i32, i32, i32) {
    %c0_i32 = arith.constant 0 : i32
    %c0_i32_0 = arith.constant 0 : i32
    %c0_i32_1 = arith.constant 0 : i32
    return %arg0, %c0_i32, %c0_i32_0 : i32, i32, i32
  }
}

</mosaic_0001>

<bundles_post_ra>
// kernel: tpu_custom_call.1
= control target key start
LH: loop header
LB: loop body
LE: loop exit
PB: predicated region body
PF: predicated region fallthrough
CT: control target
= control target key end

     0   :  { %s2130_s0 = inlined_call_operand.hbm [shape: f32[16,32], index: 0, kind: input, shape index: {}]   ;;  %s2131_s1 = inlined_call_operand.hbm [shape: bf16[2,32,128], index: 1, kind: input, shape index: {}]   ;;  %s2132_s2 = inlined_call_operand.hbm [shape: bf16[2,32,128], index: 2, kind: input, shape index: {}]   ;;  %s2133_s3 = inlined_call_operand.vmem [shape: f32[2,1,128], index: 3, kind: input, shape index: {}]   ;;  %s2134_s4 = inlined_call_operand.hbm [shape: f32[2,16,32], index: 4, kind: output, shape index: {}]  }
   0x1   :  { %2137 = sst [smem:[#allocation16_spill]] %s2130_s0 }
   0x2   :  { %2138 = sst [smem:[#allocation17_spill]] %s2131_s1 }
   0x3   :  { %9 = vsyncpa [#allocation6], 0 }
   0x4   :  { %10 = vsyncpa [#allocation9], 0 }
   0x5   :  { %12 = vsyncpa [#allocation9 + $0x1], 0 }
   0x6   :  { %13 = vsyncpa [#allocation7], 0 }
   0x7   :  { %15 = vsyncpa [#allocation7 + $0x1], 0  ;;  %s1728_s15 = smov 0   ;;  %s1730_s16 = smov 0  }
   0x8   :  { %s1732_s17 = smov 0   ;;  %s1734_s18 = smov 0  }
   0x9 LB: > { %s1749_s19 = sadd.s32 1, %s1690_s18   ;;  %s49_s20 = sadd.s32 1, %s1686_s17  ;;  %s1690_s18 = sphi %s1734_s18, %s2166_s18   ;;  %s1686_s17 = sphi %s1732_s17, %s2165_s17   ;;  %s1682_s16 = sphi %s1730_s16, %s2164_s16   ;;  %s1678_s15 = sphi %s1728_s15, %s2163_s15  }
   0xa   : > { %s46_s21 = ssub.s32 %s1690_s18, %s1749_s19  ;;  %p56_p0 = scmp.ne.s32.totalorder %s1686_s17, %s1682_s16 }
   0xb   : > { %p47_p1 = scmp.eq.s32.totalorder %s46_s21, 0  ;;  %p57_p2 = scmp.eq.s32.totalorder %s1690_s18, 0 }
   0xc   : > { %p1419_p4 = scmp.lt.s32.totalorder %s1690_s18, 2  ;;  %s178_s23 = sand.u32 1, %s1690_s18  }
   0xd   : > { %s1760_s22 = scalar_select %p47_p1, %s1686_s17, %s49_s20  }
   0xe   : > { %p58_p5 = por %p57_p2, %p56_p0  ;;  %s180_s24 = sand.u32 1, %s1686_s17  }
   0xf   : > { %2139 = sst [smem:[#allocation15_spill]] %s1760_s22  ;;  %s1767_s25 = sshll.u32 %s180_s24, 4 }
  0x10   : > { %s1372_s26 = sshll.u32 %s1690_s18, 4  ;;  %s2140_s1 = sld [smem:[#allocation17_spill]] }
  0x11   : > { %s182_s5 = scalar_lea.vmem [#allocation8], %s1767_s25  ;;  %p1776_p6 = pnand %p1419_p4, %p58_p5 }
  0x12   : > { %s190_s6 = sshll.u32 %s182_s5, 4  ;;  %s1783_s10 = scalar_lea.hbm %s2132_s2, %s1372_s26  ;;  %s191_s6 = int_to_ptr.vmem [resolvable:$true] %s190_s6 }
  0x13   : > { %s1785_s11 = scalar_lea.sflag [#allocation9], %s178_s23  ;;  %p1534_p8 = pneg %p1776_p6 }
  0x16   : > { %s187_s29 = scalar_lea.hbm %s2140_s1, %s1372_s26  ;;  %s1537_s21 = scalar_lea.hbm %s2140_s1, 32 }
  0x17   : > { %s188_s30 = sshll.u32 %s187_s29, 4  ;;  %s189_s30 = int_to_ptr.hbm [resolvable:$true] %s188_s30 }
  0x18   : > { %s1530_s12 = sshra.s32 %s189_s30, 4  ;;  %s1531_s12 = int_to_ptr.hbm [resolvable:$true] %s1530_s12 }
  0x19   : > { %s1532_s13 = scalar_lea.hbm %s1531_s12, 16  ;;  %p1538_p11 = scmp.lt.s32.totalorder %s1531_s12, %s2140_s1 }
  0x1a   : > { %p1533_p7 = scmp.ne.s32.totalorder %s1531_s12, %s1532_s13  ;;  %p1539_p12 = scmp.lt.s32.totalorder %s1537_s21, %s1532_s13 }
  0x1c   : > { %p1535_p9 = pnand %p1534_p8, %p1533_p7  ;;  %p1540_p13 = por %p1539_p12, %p1538_p11 }
  0x1e   : > { %p1536_p10 = pneg %p1535_p9 }
  0x20   : > { %p1541_p1 = pnand %p1540_p13, %p1536_p10 }
  0x22   : > { %1544 = shalt.err (!%p1541_p1)
}
  0x23   : > { %s2135_s23 = smov 64   ;;  %s1693_s26 = smov 4  }
  0x24   : > { %1410 = dma.hbm_to_vmem [thread:$0]  (!%p1776_p6), %s189_s30, 256, %s191_s6, %s1785_s11, %s2135_s23, %s2135_s23, %s1693_s26  }
  0x25   : > { %s210_s28 = sshll.u32 %s1783_s10, 4  ;;  %s204_s29 = scalar_lea.vmem [#allocation10], %s1767_s25  ;;  %s211_s28 = int_to_ptr.hbm [resolvable:$true] %s210_s28 }
  0x26   : > { %s1806_s5 = sshll.u32 %s204_s29, 4  ;;  %s1809_s8 = sadd.s32 4294967295, %s1690_s18   ;;  %s213_s5 = int_to_ptr.vmem [resolvable:$true] %s1806_s5 }
  0x27   : > { %s1255_s9 = sadd.s32 4294967294, %s1690_s18   ;;  %p62_p2 = scmp.ne.s32.totalorder %s1682_s16, %s1678_s15 }
  0x28   : > { %p2136_p4 = scmp.eq.s32.totalorder %s1809_s8, 0  ;;  %p138_p5 = scmp.eq.s32.totalorder %s1809_s8, 1 }
  0x29   : > { %p144_p7 = scmp.eq.s32.totalorder %s1255_s9, 1  ;;  %p1256_p10 = scmp.ge.s32.totalorder %s1690_s18, 1 }
  0x2a   : > { %p1818_p9 = por %p2136_p4, %p62_p2  ;;  %p1826_p11 = por %p138_p5, %p56_p0 }
  0x2b   : > { %p1830_p12 = por %p144_p7, %p62_p2  ;;  %p151_p13 = scmp.lt.s32.totalorder %s1690_s18, 3 }
  0x2c   : > { %s2145_s0 = sld [smem:[#allocation16_spill]]  ;;  %s1694_s20 = smov [#allocation5]  }
  0x2d   : > { %p1838_p1 = pnand %p1256_p10, %p151_p13  ;;  %s164_s21 = sshll.u32 %s1694_s20, 4  ;;  %s165_s21 = int_to_ptr.vmem [resolvable:$true] %s164_s21 }
  0x2e   : > { %s1560_s27 = sshra.s32 %s211_s28, 4  ;;  %s1567_s10 = scalar_lea.hbm %s2132_s2, 32  ;;  %s1561_s27 = int_to_ptr.hbm [resolvable:$true] %s1560_s27 }
  0x2f   : > { %p1403_p0 = pneg %p1838_p1  ;;  %s1562_s29 = scalar_lea.hbm %s1561_s27, 16 }
  0x30   : > { %p1563_p5 = scmp.ne.s32.totalorder %s1561_s27, %s1562_s29  ;;  %p1568_p13 = scmp.lt.s32.totalorder %s1561_s27, %s2132_s2 }
  0x31   : > { %p1847_p2 = pnand %p1403_p0, %p2136_p4  ;;  %p1569_p0 = scmp.lt.s32.totalorder %s1567_s10, %s1562_s29 }
  0x32   : > { %s162_s13 = sshll.u32 %s2145_s0, 4  ;;  %p1565_p7 = pnand %p1563_p5, %p1534_p8  ;;  %s163_s13 = int_to_ptr.hbm [resolvable:$true] %s162_s13 }
  0x33   : > { %p1570_p3 = por %p1569_p0, %p1568_p13 }
  0x34   : > { %p1566_p10 = pneg %p1565_p7 }
  0x36   : > { %p1571_p4 = pnand %p1570_p3, %p1566_p10 }
  0x38   : > { %1574 = shalt.err (!%p1571_p4)
}
  0x39   : > { %s2148_s0 = smov 64   ;;  %s1695_s1 = smov 128  }
  0x3a   : > { %1413 = dma.hbm_to_vmem [thread:$0]  (!%p1776_p6), %s211_s28, 256, %s213_s5, %s1785_s11, %s2148_s0, %s2148_s0, %s1693_s26  }
  0x3b   : > { %s1696_s22 = smov 8   ;;  %230 = sbr.rel (%p1838_p1) target bundleno = 5042 (0x13b2), region = 36 }
  0x3c   : > { %1406 = dma.hbm_to_vmem [thread:$0]  (!%p1847_p2), %s163_s13, 256, %s165_s21, [#allocation6], %s1695_s1, %s1695_s1, %s1696_s22  }
  0x3d   : > { %p2149_p8 = scmp.eq.s32.totalorder (!%p1838_p1), %s1809_s8, 0 }
  0x40   : > { %1665 = dma.done.wait (%p2149_p8), [#allocation6], 256   ;;  %p2150_p3 = pmov %p2149_p8 }
  0x41   : > { %s237_s7 = sand.u32 1, %s1809_s8   ;;  %s239_s23 = sand.u32 1, %s1682_s16  }
  0x42   : > { %1667 = vsyncadd (%p2150_p3), [#allocation6], 4294967040  ;;  %s1878_s0 = sshll.u32 %s239_s23, 4  ;;  %s238_s1 = scalar_lea.sflag [#allocation9], %s237_s7 }
  0x43   : > { %s241_s22 = scalar_lea.vmem [#allocation8], %s1878_s0 }
  0x44   : > { %1669 = dma.done.wait (%p1818_p9), %s238_s1, 512  }
  0x45   : > { %1671 = vsyncadd (%p1818_p9), %s238_s1, 4294966784  ;;  %vm332_vm0 = vcmask 254976   ;;  %p285_p6 = scmp.lt.s32.totalorder %s1809_s8, 1  ;;  %v1697_v0 = vmov 0.0   ;;  %v1375_v1 = vld [vmem:[%s241_s22 + $0x8] sm:$0xff]  ;;  %v1374_v2 = vld [vmem:[%s241_s22] sm:$0xff]  ;;  %p2151_p4 = pmov %p2150_p3  ;;  %v335_v22 = vlaneseq }
  0x46   : > { %333 = vst.msk [vmem:[#allocation3] sm:$0x3] %vm332_vm0, %v1697_v0  ;;  %s1890_s26 = scalar_lea.vmem [#allocation10], %s1878_s0  ;;  %322 = vmatpush.bf16.msra.mxu0 %v1375_v1  ;;  %v289_v4 = vld [vmem:[#allocation5] sm:$0xff]  ;;  %v290_v5 = vld [vmem:[#allocation5 + $0x8] sm:$0xff]  ;;  %vm312_vm1 = vcmask 261120   ;;  %p2154_p9 = pmov %p2150_p3 }
  0x47   : > { %334 = vst.msk [vmem:[#allocation4] sm:$0x3] %vm332_vm0, %v1697_v0  ;;  %s286_s11 = scalar_select %p285_p6, %s1809_s8, 1  ;;  %v1377_v3 = vld [vmem:[%s1890_s26 + $0x8] sm:$0xff]  ;;  %v1376_v6 = vld [vmem:[%s1890_s26] sm:$0xff]  ;;  %v291_v8 = vpack.c.bf16 %v290_v5, %v289_v4  ;;  %v336_v24 = vand.u32 127, %v335_v22 }
  0x48   : > { %372 = vmatpush.bf16.msra.mxu1 %v1377_v3  ;;  %s1901_s13 = scalar_select %p2151_p4, 0, 7  ;;  %v1379_v47 = vld [vmem:[%s1890_s26 + $0x8] sm:$0xff]  ;;  %v1378_v48 = vld [vmem:[%s1890_s26] sm:$0xff] }
  0x49   : > { %s287_s12 = scalar_lea.vmem %s2133_s3, %s286_s11  ;;  %vm337_vm2 = vcmp.ge.s32.totalorder %v336_v24, 64  ;;  %vm338_vm3 = vcmp.lt.s32.totalorder %v336_v24, 96  ;;  %s1698_s24 = smov 64   ;;  %466 = vmatpush.bf16.msra.mxu2 %v1379_v47 }
  0x4a   : > { %323 = vmatpush.bf16.msra.mxu0 %v1374_v2  ;;  %v1465_v10 = vld [vmem:[%s287_s12] ss:$0 sm:$0xff]  ;;  %s1279_s14 = sshll.u32 %s1901_s13, 1  ;;  %vm1906_vm5 = vmand %vm337_vm2, %vm338_vm3  ;;  %s1699_s27 = smov 32  }
  0x4b   : > { %s343_s21 = scalar_lea.vmem [#allocation2], %s1279_s14  ;;  %s1700_s29 = smov 96  }
  0x4c   : > { %373 = vmatpush.bf16.msra.mxu1 %v1376_v6  ;;  %s1921_s9 = scalar_lea.vmem [#allocation11], %s1878_s0  ;;  %p2155_p1 = pmov %p2150_p3 }
  0x4d   : > { %v345_v7 = vld [vmem:[#allocation3] sm:$0x3]  ;;  %1278 = vmatmul.msk.bf16.vlgmr.msra.gmra.mxu0 %vm312_vm1, %v291_v8  ;;  %467 = vmatpush.bf16.msra.mxu2 %v1378_v48  ;;  %s433_s6 = scalar_lea.vmem %s1921_s9, %s1279_s14 [#allocation11] }
  0x4e   : > { %v346_v9 = vpack.c.bf16 %v345_v7, %v345_v7  ;;  %v401_v37 = vld [vmem:[#allocation4] sm:$0x3]  ;;  %s1933_s10 = scalar_select %p2154_p9, 1, 6 }
  0x4f   : > { %s1957_s1 = scalar_select %p2155_p1, 2, 5 }
  0x50   : > { %1288 = vmatmul.msk.bf16.vlgmr.msra.gmra.mxu1 %vm312_vm1, %v346_v9  ;;  %s1290_s20 = sshll.u32 %s1933_s10, 1  ;;  %p2156_p2 = pmov %p2155_p1 }
  0x51   : > { %s437_s7 = scalar_lea.vmem [#allocation2], %s1290_s20  ;;  %s527_s0 = scalar_lea.vmem %s1921_s9, %s1290_s20 [#allocation11] }
  0x52   : > { %s1301_s22 = sshll.u32 %s1957_s1, 1  ;;  %p2157_p5 = pmov %p2155_p1 }
  0x53   : > { %s531_s11 = scalar_lea.vmem [#allocation2], %s1301_s22  ;;  %s621_s28 = scalar_lea.vmem %s1921_s9, %s1301_s22 [#allocation11] }
  0x54   : > { %s1981_s5 = scalar_select %p2156_p2, 3, 4 }
  0x55   : > { %p2158_p7 = pmov %p2155_p1  ;;  %p2159_p10 = pmov %p2155_p1 }
  0x56   : > { %s1312_s12 = sshll.u32 %s1981_s5, 1  ;;  %p2160_p13 = pmov %p2155_p1 }
  0x57   : > { %s625_s13 = scalar_lea.vmem [#allocation2], %s1312_s12  ;;  %s715_s14 = scalar_lea.vmem %s1921_s9, %s1312_s12 [#allocation11] }
  0xca   : > { %v325_v11 = vpop.f32.mrf.mxu0 }
  0xcb   : > { %v326_v12 = vadd.f32 %v1465_v10, %v325_v11 }
  0xcd   : > { %v375_v13 = vpop.f32.mrf.mxu1  ;;  %330 = vst [vmem:[#allocation2] sm:$0xff] %v326_v12 }
  0xd2   : > { %v327_v14 = vpop.f32.mrf.mxu0 }
  0xd3   : > { %v328_v15 = vadd.f32 %v1465_v10, %v327_v14 }
  0xd5   : > { %v377_v16 = vpop.f32.mrf.mxu1  ;;  %331 = vst [vmem:[#allocation2 + $0x8] sm:$0xff] %v328_v15 }
  0xdc   : > { %v344_v17 = vld [vmem:[%s343_s21] sm:$0x3]  ;;  %s2005_s21 = scalar_select %p2157_p5, 4, 3 }
  0xdd   : > { %v379_v18 = vadd.f32 %v375_v13, %v344_v17  ;;  %v438_v54 = vld [vmem:[%s437_s7] sm:$0x3]  ;;  %s2029_s7 = scalar_select %p2158_p7, 5, 2 }
  0xdf   : > { %v1289_v19 = vmul.f32 -1.442695, %v379_v18 }
  0xe1   : > { %1466 = vpow2.f32 %v1289_v19 }
  0xe7   : > { %v1467_v20 = vpop.eup %1466 }
  0xe8   : > { %v384_v21 = vadd.f32 1.0, %v1467_v20  ;;  %v1381_v20 = vld [vmem:[%s1890_s26 + $0x8] sm:$0xff] }
  0xe9   : > { %560 = vmatpush.bf16.msra.mxu3 %v1381_v20 }
  0xea   : > { %1468 = vrcp.f32 %v384_v21  ;;  %v396_v27 = vand.u32 2147483648, %v384_v21  ;;  %v394_v29 = vand.u32 2147483647, %v384_v21  ;;  %vm390_vm6 = vweird.f32 %v384_v21 }
  0xeb   : > { %1470 = vtanh.f32 %v379_v18 }
  0xec   : > { %v397_v32 = vor.u32 1.1754944e-38, %v396_v27  ;;  %vm395_vm8 = vcmp.eq.f32.partialorder %v394_v29, 8.507059e+37 }
  0xf0   : > { %v1469_v23 = vpop.eup %1468 }
  0xf1   : > { %v386_v25 = vmul.f32 %v1469_v23, %v384_v21  ;;  %vm391_vm4 = vweird.f32 %v1469_v23  ;;  %v1471_v34 = vpop.eup %1470  ;;  %v1380_v21 = vld [vmem:[%s1890_s26] sm:$0xff] }
  0xf2   : > { %vm392_vm7 = vmor %vm390_vm6, %vm391_vm4  ;;  %561 = vmatpush.bf16.msra.mxu3 %v1380_v21 }
  0xf3   : > { %v387_v26 = vsub.f32 1.0, %v386_v25  ;;  %v532_v25 = vld [vmem:[%s531_s11] sm:$0x3]  ;;  %s2053_s11 = scalar_select %p2159_p10, 6, 1 }
  0xf5   : > { %v388_v28 = vmul.f32 %v1469_v23, %v387_v26 }
  0xf7   : > { %v389_v31 = vadd.f32 %v1469_v23, %v388_v28 }
  0xf9   : > { %v393_v33 = vsel %vm392_vm7, %v1469_v23, %v389_v31 }
  0xfa   : > { %v398_v35 = vsel %vm395_vm8, %v397_v32, %v393_v33 }
  0xfb   : > { %v400_v36 = vsel %vm1906_vm5, %v1471_v34, %v398_v35 }
  0xfc   : > { %408 = vrot.lane.b32.xlu0 %v400_v36, %s1698_s24 }
 0x104   : > { %403 = vrot.lane.b32.xlu0 %v401_v37, %s1699_s27 }
 0x16e   : > { %v409_v38 = vpop.permute.xlu0 %408 }
 0x16f   : > { %v411_v39 = vmul.f32 %v409_v38, %v400_v36 }
 0x171   : > { %413 = vrot.lane.b32.xlu1 %v411_v39, %s1699_s27 }
 0x176   : > { %v404_v40 = vpop.permute.xlu0 %403 }
 0x177   : > { %v406_v41 = vmul.f32 %v404_v40, %v400_v36 }
 0x1e3   : > { %v414_v42 = vpop.permute.xlu1 %413 }
 0x1e4   : > { %v416_v43 = vadd.f32 %v414_v42, %v406_v41 }
 0x1e6   : > { %1472 = vtanh.f32 %v416_v43 }
 0x1ec   : > { %v1473_v44 = vpop.eup %1472 }
 0x1ed   : > { %419 = vrot.lane.b32.xlu1 %v1473_v44, %s1698_s24 }
 0x25f   : > { %v420_v45 = vpop.permute.xlu1 %419 }
 0x260   : > { %v422_v46 = vmul.f32 %v420_v45, %v400_v36 }
 0x262   : > { %429 = vrot.lane.b32.xlu2 %v422_v46, %s1699_s27 }
 0x26a   : > { %424 = vrot.lane.b32.xlu2 %v416_v43, %s1700_s29 }
 0x2bc   : > { %v430_v49 = vpop.permute.xlu2 %429 }
 0x2bd   : > { %432 = vst.msk [vmem:[#allocation3] sm:$0x3] %vm332_vm0, %v430_v49 }
 0x2be   : > { %434 = vst.msk [vmem:[%s433_s6] sm:$0x3] %vm332_vm0, %v430_v49  ;;  %s1323_s6 = sshll.u32 %s2005_s21, 1  ;;  %s1392_s21 = sshll.u32 %s1809_s8, 4 }
 0x2bf   : > { %s719_s10 = scalar_lea.vmem [#allocation2], %s1323_s6  ;;  %s809_s20 = scalar_lea.vmem %s1921_s9, %s1323_s6 [#allocation11] }
 0x2c4   : > { %v425_v50 = vpop.permute.xlu2 %424  ;;  %v439_v51 = vld [vmem:[#allocation3] sm:$0x3] }
 0x2c5   : > { %427 = vst.msk [vmem:[#allocation4] sm:$0x3] %vm332_vm0, %v425_v50  ;;  %v440_v52 = vpack.c.bf16 %v439_v51, %v439_v51 }
 0x2c7   : > { %1299 = vmatmul.msk.bf16.vlgmr.msra.gmra.mxu2 %vm312_vm1, %v440_v52 }
 0x2cc   : > { %v495_v53 = vld [vmem:[#allocation4] sm:$0x3] }
 0x2cd   : > { %497 = vrot.lane.b32.xlu1 %v495_v53, %s1699_s27  ;;  %v1383_v53 = vld [vmem:[%s1890_s26 + $0x8] sm:$0xff] }
 0x2ce   : > { %654 = vmatpush.bf16.msrb.mxu0 %v1383_v53 }
 0x33f   : > { %v498_v11 = vpop.permute.xlu1 %497 }
 0x34a   : > { %v469_v55 = vpop.f32.mrf.mxu2 }
 0x34b   : > { %v473_v56 = vadd.f32 %v469_v55, %v438_v54 }
 0x34d   : > { %v1300_v57 = vmul.f32 -1.442695, %v473_v56 }
 0x34f   : > { %1474 = vpow2.f32 %v1300_v57  ;;  %v1382_v57 = vld [vmem:[%s1890_s26] sm:$0xff] }
 0x350   : > { %655 = vmatpush.bf16.msrb.mxu0 %v1382_v57 }
 0x352   : > { %v471_v58 = vpop.f32.mrf.mxu2 }
 0x355   : > { %v1475_v59 = vpop.eup %1474 }
 0x356   : > { %v478_v60 = vadd.f32 1.0, %v1475_v59 }
 0x358   : > { %1476 = vrcp.f32 %v478_v60  ;;  %v490_v0 = vand.u32 2147483648, %v478_v60  ;;  %v488_v2 = vand.u32 2147483647, %v478_v60  ;;  %vm484_vm10 = vweird.f32 %v478_v60 }
 0x359   : > { %1478 = vtanh.f32 %v473_v56 }
 0x35a   : > { %v491_v4 = vor.u32 1.1754944e-38, %v490_v0  ;;  %vm489_vm12 = vcmp.eq.f32.partialorder %v488_v2, 8.507059e+37 }
 0x35e   : > { %v1477_v61 = vpop.eup %1476 }
 0x35f   : > { %v480_v62 = vmul.f32 %v1477_v61, %v478_v60  ;;  %vm485_vm9 = vweird.f32 %v1477_v61  ;;  %v1479_v6 = vpop.eup %1478 }
 0x360   : > { %vm486_vm11 = vmor %vm484_vm10, %vm485_vm9 }
 0x361   : > { %v481_v63 = vsub.f32 1.0, %v480_v62 }
 0x363   : > { %v482_v1 = vmul.f32 %v1477_v61, %v481_v63 }
 0x365   : > { %v483_v3 = vadd.f32 %v1477_v61, %v482_v1 }
 0x367   : > { %v487_v5 = vsel %vm486_vm11, %v1477_v61, %v483_v3  ;;  %v626_v61 = vld [vmem:[%s625_s13] sm:$0x3]  ;;  %s2077_s13 = scalar_select %p2160_p13, 7, 0 }
 0x368   : > { %v492_v7 = vsel %vm489_vm12, %v491_v4, %v487_v5 }
 0x369   : > { %v494_v8 = vsel %vm1906_vm5, %v1479_v6, %v492_v7 }
 0x36a   : > { %502 = vrot.lane.b32.xlu0 %v494_v8, %s1698_s24  ;;  %v500_v12 = vmul.f32 %v498_v11, %v494_v8 }
 0x3dc   : > { %v503_v9 = vpop.permute.xlu0 %502 }
 0x3dd   : > { %v505_v10 = vmul.f32 %v503_v9, %v494_v8 }
 0x3df   : > { %507 = vrot.lane.b32.xlu2 %v505_v10, %s1699_s27 }
 0x439   : > { %v508_v13 = vpop.permute.xlu2 %507 }
 0x43a   : > { %v510_v14 = vadd.f32 %v508_v13, %v500_v12 }
 0x43c   : > { %1480 = vtanh.f32 %v510_v14  ;;  %518 = vrot.lane.b32.xlu2 %v510_v14, %s1700_s29 }
 0x442   : > { %v1481_v15 = vpop.eup %1480 }
 0x443   : > { %513 = vrot.lane.b32.xlu0 %v1481_v15, %s1698_s24 }
 0x496   : > { %v519_v16 = vpop.permute.xlu2 %518 }
 0x497   : > { %521 = vst.msk [vmem:[#allocation4] sm:$0x3] %vm332_vm0, %v519_v16 }
 0x49e   : > { %v589_v19 = vld [vmem:[#allocation4] sm:$0x3] }
 0x4b5   : > { %v514_v17 = vpop.permute.xlu0 %513 }
 0x4b6   : > { %v516_v18 = vmul.f32 %v514_v17, %v494_v8 }
 0x4b8   : > { %523 = vrot.lane.b32.xlu1 %v516_v18, %s1699_s27 }
 0x4c0   : > { %591 = vrot.lane.b32.xlu1 %v589_v19, %s1699_s27 }
 0x52a   : > { %v524_v22 = vpop.permute.xlu1 %523 }
 0x52b   : > { %526 = vst.msk [vmem:[#allocation3] sm:$0x3] %vm332_vm0, %v524_v22 }
 0x52c   : > { %528 = vst.msk [vmem:[%s527_s0] sm:$0x3] %vm332_vm0, %v524_v22  ;;  %s1334_s0 = sshll.u32 %s2029_s7, 1  ;;  %s1106_s7 = sshll.u32 %s1921_s9, 4  ;;  %s1107_s7 = int_to_ptr.vmem [resolvable:$true] %s1106_s7 }
 0x52d   : > { %s813_s1 = scalar_lea.vmem [#allocation2], %s1334_s0  ;;  %s903_s22 = scalar_lea.vmem %s1921_s9, %s1334_s0 [#allocation11] }
 0x532   : > { %v533_v23 = vld [vmem:[#allocation3] sm:$0x3]  ;;  %v592_v47 = vpop.permute.xlu1 %591 }
 0x533   : > { %v534_v24 = vpack.c.bf16 %v533_v23, %v533_v23 }
 0x535   : > { %1310 = vmatmul.msk.bf16.vlgmr.msra.gmra.mxu3 %vm312_vm1, %v534_v24  ;;  %v1385_v24 = vld [vmem:[%s1890_s26 + $0x8] sm:$0xff] }
 0x536   : > { %748 = vmatpush.bf16.msrb.mxu1 %v1385_v24 }
 0x5b8   : > { %v563_v26 = vpop.f32.mrf.mxu3 }
 0x5b9   : > { %v567_v27 = vadd.f32 %v563_v26, %v532_v25 }
 0x5bb   : > { %v1311_v28 = vmul.f32 -1.442695, %v567_v27 }
 0x5bd   : > { %1482 = vpow2.f32 %v1311_v28  ;;  %v1384_v28 = vld [vmem:[%s1890_s26] sm:$0xff] }
 0x5be   : > { %749 = vmatpush.bf16.msrb.mxu1 %v1384_v28 }
 0x5c0   : > { %v565_v29 = vpop.f32.mrf.mxu3 }
 0x5c3   : > { %v1483_v31 = vpop.eup %1482 }
 0x5c4   : > { %v572_v32 = vadd.f32 1.0, %v1483_v31 }
 0x5c6   : > { %1484 = vrcp.f32 %v572_v32  ;;  %v584_v36 = vand.u32 2147483648, %v572_v32  ;;  %v582_v38 = vand.u32 2147483647, %v572_v32  ;;  %vm578_vm14 = vweird.f32 %v572_v32 }
 0x5c7   : > { %1486 = vtanh.f32 %v567_v27 }
 0x5c8   : > { %v585_v40 = vor.u32 1.1754944e-38, %v584_v36  ;;  %vm583_vm2 = vcmp.eq.f32.partialorder %v582_v38, 8.507059e+37 }
 0x5cc   : > { %v1485_v33 = vpop.eup %1484 }
 0x5cd   : > { %v574_v34 = vmul.f32 %v1485_v33, %v572_v32  ;;  %vm579_vm13 = vweird.f32 %v1485_v33  ;;  %v1487_v42 = vpop.eup %1486 }
 0x5ce   : > { %vm580_vm15 = vmor %vm578_vm14, %vm579_vm13 }
 0x5cf   : > { %v575_v35 = vsub.f32 1.0, %v574_v34 }
 0x5d1   : > { %v576_v37 = vmul.f32 %v1485_v33, %v575_v35 }
 0x5d3   : > { %v577_v39 = vadd.f32 %v1485_v33, %v576_v37 }
 0x5d5   : > { %v581_v41 = vsel %vm580_vm15, %v1485_v33, %v577_v39  ;;  %v720_v33 = vld [vmem:[%s719_s10] sm:$0x3] }
 0x5d6   : > { %v586_v43 = vsel %vm583_vm2, %v585_v40, %v581_v41 }
 0x5d7   : > { %v588_v44 = vsel %vm1906_vm5, %v1487_v42, %v586_v43 }
 0x5d8   : > { %596 = vrot.lane.b32.xlu0 %v588_v44, %s1698_s24  ;;  %v594_v48 = vmul.f32 %v592_v47, %v588_v44 }
 0x64a   : > { %v597_v45 = vpop.permute.xlu0 %596 }
 0x64b   : > { %v599_v46 = vmul.f32 %v597_v45, %v588_v44 }
 0x64d   : > { %601 = vrot.lane.b32.xlu2 %v599_v46, %s1699_s27 }
 0x6a7   : > { %v602_v49 = vpop.permute.xlu2 %601 }
 0x6a8   : > { %v604_v50 = vadd.f32 %v602_v49, %v594_v48 }
 0x6aa   : > { %1488 = vtanh.f32 %v604_v50  ;;  %612 = vrot.lane.b32.xlu2 %v604_v50, %s1700_s29 }
 0x6b0   : > { %v1489_v51 = vpop.eup %1488 }
 0x6b1   : > { %607 = vrot.lane.b32.xlu0 %v1489_v51, %s1698_s24 }
 0x704   : > { %v613_v52 = vpop.permute.xlu2 %612 }
 0x705   : > { %615 = vst.msk [vmem:[#allocation4] sm:$0x3] %vm332_vm0, %v613_v52 }
 0x70c   : > { %v683_v56 = vld [vmem:[#allocation4] sm:$0x3] }
 0x723   : > { %v608_v54 = vpop.permute.xlu0 %607 }
 0x724   : > { %v610_v55 = vmul.f32 %v608_v54, %v588_v44 }
 0x726   : > { %617 = vrot.lane.b32.xlu1 %v610_v55, %s1699_s27 }
 0x72e   : > { %685 = vrot.lane.b32.xlu1 %v683_v56, %s1699_s27 }
 0x798   : > { %v618_v58 = vpop.permute.xlu1 %617 }
 0x799   : > { %620 = vst.msk [vmem:[#allocation3] sm:$0x3] %vm332_vm0, %v618_v58 }
 0x79a   : > { %622 = vst.msk [vmem:[%s621_s28] sm:$0x3] %vm332_vm0, %v618_v58  ;;  %s1345_s28 = sshll.u32 %s2053_s11, 1 }
 0x79b   : > { %s907_s5 = scalar_lea.vmem [#allocation2], %s1345_s28  ;;  %s997_s12 = scalar_lea.vmem %s1921_s9, %s1345_s28 [#allocation11] }
 0x7a0   : > { %v627_v59 = vld [vmem:[#allocation3] sm:$0x3]  ;;  %v686_v18 = vpop.permute.xlu1 %685 }
 0x7a1   : > { %v628_v60 = vpack.c.bf16 %v627_v59, %v627_v59 }
 0x7a3   : > { %1321 = vmatmul.msk.bf16.vlgmr.msrb.gmra.mxu0 %vm312_vm1, %v628_v60  ;;  %v1387_v60 = vld [vmem:[%s1890_s26 + $0x8] sm:$0xff] }
 0x7a4   : > { %842 = vmatpush.bf16.msrb.mxu2 %v1387_v60 }
 0x820   : > { %v657_v62 = vpop.f32.mrf.mxu0 }
 0x821   : > { %v661_v63 = vadd.f32 %v657_v62, %v626_v61 }
 0x823   : > { %v1322_v0 = vmul.f32 -1.442695, %v661_v63 }
 0x825   : > { %1490 = vpow2.f32 %v1322_v0  ;;  %v1386_v0 = vld [vmem:[%s1890_s26] sm:$0xff] }
 0x826   : > { %843 = vmatpush.bf16.msrb.mxu2 %v1386_v0 }
 0x828   : > { %v659_v1 = vpop.f32.mrf.mxu0 }
 0x82b   : > { %v1491_v2 = vpop.eup %1490 }
 0x82c   : > { %v666_v3 = vadd.f32 1.0, %v1491_v2 }
 0x82e   : > { %1492 = vrcp.f32 %v666_v3  ;;  %v678_v7 = vand.u32 2147483648, %v666_v3  ;;  %v676_v9 = vand.u32 2147483647, %v666_v3  ;;  %vm672_vm4 = vweird.f32 %v666_v3 }
 0x82f   : > { %1494 = vtanh.f32 %v661_v63 }
 0x830   : > { %v679_v11 = vor.u32 1.1754944e-38, %v678_v7  ;;  %vm677_vm7 = vcmp.eq.f32.partialorder %v676_v9, 8.507059e+37 }
 0x834   : > { %v1493_v4 = vpop.eup %1492 }
 0x835   : > { %v668_v5 = vmul.f32 %v1493_v4, %v666_v3  ;;  %vm673_vm3 = vweird.f32 %v1493_v4  ;;  %v1495_v13 = vpop.eup %1494 }
 0x836   : > { %vm674_vm6 = vmor %vm672_vm4, %vm673_vm3 }
 0x837   : > { %v669_v6 = vsub.f32 1.0, %v668_v5 }
 0x839   : > { %v670_v8 = vmul.f32 %v1493_v4, %v669_v6 }
 0x83b   : > { %v671_v10 = vadd.f32 %v1493_v4, %v670_v8 }
 0x83d   : > { %v675_v12 = vsel %vm674_vm6, %v1493_v4, %v671_v10  ;;  %v814_v4 = vld [vmem:[%s813_s1] sm:$0x3] }
 0x83e   : > { %v680_v14 = vsel %vm677_vm7, %v679_v11, %v675_v12 }
 0x83f   : > { %v682_v15 = vsel %vm1906_vm5, %v1495_v13, %v680_v14 }
 0x840   : > { %690 = vrot.lane.b32.xlu0 %v682_v15, %s1698_s24  ;;  %v688_v19 = vmul.f32 %v686_v18, %v682_v15 }
 0x8b2   : > { %v691_v16 = vpop.permute.xlu0 %690 }
 0x8b3   : > { %v693_v17 = vmul.f32 %v691_v16, %v682_v15 }
 0x8b5   : > { %695 = vrot.lane.b32.xlu2 %v693_v17, %s1699_s27 }
 0x90f   : > { %v696_v20 = vpop.permute.xlu2 %695 }
 0x910   : > { %v698_v21 = vadd.f32 %v696_v20, %v688_v19 }
 0x912   : > { %1496 = vtanh.f32 %v698_v21  ;;  %706 = vrot.lane.b32.xlu2 %v698_v21, %s1700_s29 }
 0x918   : > { %v1497_v22 = vpop.eup %1496 }
 0x919   : > { %701 = vrot.lane.b32.xlu0 %v1497_v22, %s1698_s24 }
 0x96c   : > { %v707_v23 = vpop.permute.xlu2 %706 }
 0x96d   : > { %709 = vst.msk [vmem:[#allocation4] sm:$0x3] %vm332_vm0, %v707_v23 }
 0x974   : > { %v777_v27 = vld [vmem:[#allocation4] sm:$0x3] }
 0x98b   : > { %v702_v25 = vpop.permute.xlu0 %701 }
 0x98c   : > { %v704_v26 = vmul.f32 %v702_v25, %v682_v15 }
 0x98e   : > { %711 = vrot.lane.b32.xlu1 %v704_v26, %s1699_s27 }
 0x996   : > { %779 = vrot.lane.b32.xlu1 %v777_v27, %s1699_s27 }
 0xa00   : > { %v712_v29 = vpop.permute.xlu1 %711 }
 0xa01   : > { %714 = vst.msk [vmem:[#allocation3] sm:$0x3] %vm332_vm0, %v712_v29 }
 0xa02   : > { %716 = vst.msk [vmem:[%s715_s14] sm:$0x3] %vm332_vm0, %v712_v29  ;;  %s1356_s14 = sshll.u32 %s2077_s13, 1 }
 0xa08   : > { %v721_v31 = vld [vmem:[#allocation3] sm:$0x3]  ;;  %v780_v54 = vpop.permute.xlu1 %779 }
 0xa09   : > { %v722_v32 = vpack.c.bf16 %v721_v31, %v721_v31 }
 0xa0b   : > { %1332 = vmatmul.msk.bf16.vlgmr.msrb.gmra.mxu1 %vm312_vm1, %v722_v32  ;;  %v1389_v32 = vld [vmem:[%s1890_s26 + $0x8] sm:$0xff] }
 0xa0c   : > { %936 = vmatpush.bf16.msrb.mxu3 %v1389_v32 }
 0xa88   : > { %v751_v34 = vpop.f32.mrf.mxu1 }
 0xa89   : > { %v755_v35 = vadd.f32 %v751_v34, %v720_v33 }
 0xa8b   : > { %v1333_v36 = vmul.f32 -1.442695, %v755_v35 }
 0xa8d   : > { %1498 = vpow2.f32 %v1333_v36  ;;  %v1388_v36 = vld [vmem:[%s1890_s26] sm:$0xff] }
 0xa8e   : > { %937 = vmatpush.bf16.msrb.mxu3 %v1388_v36 }
 0xa90   : > { %v753_v37 = vpop.f32.mrf.mxu1 }
 0xa93   : > { %v1499_v38 = vpop.eup %1498 }
 0xa94   : > { %v760_v39 = vadd.f32 1.0, %v1499_v38 }
 0xa96   : > { %1500 = vrcp.f32 %v760_v39  ;;  %v772_v43 = vand.u32 2147483648, %v760_v39  ;;  %v770_v45 = vand.u32 2147483647, %v760_v39  ;;  %vm766_vm9 = vweird.f32 %v760_v39 }
 0xa97   : > { %1502 = vtanh.f32 %v755_v35 }
 0xa98   : > { %v773_v47 = vor.u32 1.1754944e-38, %v772_v43  ;;  %vm771_vm11 = vcmp.eq.f32.partialorder %v770_v45, 8.507059e+37 }
 0xa9c   : > { %v1501_v40 = vpop.eup %1500 }
 0xa9d   : > { %v762_v41 = vmul.f32 %v1501_v40, %v760_v39  ;;  %vm767_vm8 = vweird.f32 %v1501_v40  ;;  %v1503_v49 = vpop.eup %1502 }
 0xa9e   : > { %vm768_vm10 = vmor %vm766_vm9, %vm767_vm8 }
 0xa9f   : > { %v763_v42 = vsub.f32 1.0, %v762_v41 }
 0xaa1   : > { %v764_v44 = vmul.f32 %v1501_v40, %v763_v42 }
 0xaa3   : > { %v765_v46 = vadd.f32 %v1501_v40, %v764_v44 }
 0xaa5   : > { %v769_v48 = vsel %vm768_vm10, %v1501_v40, %v765_v46  ;;  %v908_v40 = vld [vmem:[%s907_s5] sm:$0x3] }
 0xaa6   : > { %v774_v50 = vsel %vm771_vm11, %v773_v47, %v769_v48 }
 0xaa7   : > { %v776_v51 = vsel %vm1906_vm5, %v1503_v49, %v774_v50 }
 0xaa8   : > { %784 = vrot.lane.b32.xlu0 %v776_v51, %s1698_s24  ;;  %v782_v55 = vmul.f32 %v780_v54, %v776_v51 }
 0xb1a   : > { %v785_v52 = vpop.permute.xlu0 %784 }
 0xb1b   : > { %v787_v53 = vmul.f32 %v785_v52, %v776_v51 }
 0xb1d   : > { %789 = vrot.lane.b32.xlu2 %v787_v53, %s1699_s27 }
 0xb77   : > { %v790_v56 = vpop.permute.xlu2 %789 }
 0xb78   : > { %v792_v57 = vadd.f32 %v790_v56, %v782_v55 }
 0xb7a   : > { %1504 = vtanh.f32 %v792_v57  ;;  %800 = vrot.lane.b32.xlu2 %v792_v57, %s1700_s29 }
 0xb80   : > { %v1505_v58 = vpop.eup %1504 }
 0xb81   : > { %795 = vrot.lane.b32.xlu0 %v1505_v58, %s1698_s24 }
 0xbd4   : > { %v801_v59 = vpop.permute.xlu2 %800 }
 0xbd5   : > { %803 = vst.msk [vmem:[#allocation4] sm:$0x3] %vm332_vm0, %v801_v59 }
 0xbdc   : > { %v871_v63 = vld [vmem:[#allocation4] sm:$0x3] }
 0xbf3   : > { %v796_v61 = vpop.permute.xlu0 %795 }
 0xbf4   : > { %v798_v62 = vmul.f32 %v796_v61, %v776_v51 }
 0xbf6   : > { %805 = vrot.lane.b32.xlu1 %v798_v62, %s1699_s27 }
 0xbfe   : > { %873 = vrot.lane.b32.xlu1 %v871_v63, %s1699_s27 }
 0xc68   : > { %v806_v1 = vpop.permute.xlu1 %805 }
 0xc69   : > { %808 = vst.msk [vmem:[#allocation3] sm:$0x3] %vm332_vm0, %v806_v1 }
 0xc6a   : > { %810 = vst.msk [vmem:[%s809_s20] sm:$0x3] %vm332_vm0, %v806_v1  ;;  %s1105_s20 = scalar_lea.hbm %s2134_s4, %s1392_s21 }
 0xc6b   : > { %s1108_s0 = sshll.u32 %s1105_s20, 4  ;;  %s1109_s0 = int_to_ptr.hbm [resolvable:$true] %s1108_s0 }
 0xc70   : > { %v815_v2 = vld [vmem:[#allocation3] sm:$0x3]  ;;  %v874_v25 = vpop.permute.xlu1 %873 }
 0xc71   : > { %v816_v3 = vpack.c.bf16 %v815_v2, %v815_v2 }
 0xc73   : > { %1343 = vmatmul.msk.bf16.vlgmr.msrb.gmra.mxu2 %vm312_vm1, %v816_v3  ;;  %v1391_v3 = vld [vmem:[%s1890_s26 + $0x8] sm:$0xff] }
 0xc74   : > { %1030 = vmatpush.bf16.msra.mxu0 %v1391_v3 }
 0xcf6   : > { %v845_v5 = vpop.f32.mrf.mxu2 }
 0xcf7   : > { %v849_v6 = vadd.f32 %v845_v5, %v814_v4 }
 0xcf9   : > { %v1344_v7 = vmul.f32 -1.442695, %v849_v6 }
 0xcfb   : > { %1506 = vpow2.f32 %v1344_v7  ;;  %v1390_v7 = vld [vmem:[%s1890_s26] sm:$0xff]  ;;  %s1001_s26 = scalar_lea.vmem [#allocation2], %s1356_s14 }
 0xcfc   : > { %1031 = vmatpush.bf16.msra.mxu0 %v1390_v7 }
 0xcfe   : > { %v847_v8 = vpop.f32.mrf.mxu2 }
 0xd01   : > { %v1507_v9 = vpop.eup %1506 }
 0xd02   : > { %v854_v10 = vadd.f32 1.0, %v1507_v9 }
 0xd04   : > { %1508 = vrcp.f32 %v854_v10  ;;  %v866_v14 = vand.u32 2147483648, %v854_v10  ;;  %v864_v16 = vand.u32 2147483647, %v854_v10  ;;  %vm860_vm13 = vweird.f32 %v854_v10 }
 0xd05   : > { %1510 = vtanh.f32 %v849_v6 }
 0xd06   : > { %v867_v18 = vor.u32 1.1754944e-38, %v866_v14  ;;  %vm865_vm15 = vcmp.eq.f32.partialorder %v864_v16, 8.507059e+37 }
 0xd0a   : > { %v1509_v11 = vpop.eup %1508 }
 0xd0b   : > { %v856_v12 = vmul.f32 %v1509_v11, %v854_v10  ;;  %vm861_vm12 = vweird.f32 %v1509_v11  ;;  %v1511_v20 = vpop.eup %1510 }
 0xd0c   : > { %vm862_vm14 = vmor %vm860_vm13, %vm861_vm12 }
 0xd0d   : > { %v857_v13 = vsub.f32 1.0, %v856_v12 }
 0xd0f   : > { %v858_v15 = vmul.f32 %v1509_v11, %v857_v13 }
 0xd11   : > { %v859_v17 = vadd.f32 %v1509_v11, %v858_v15 }
 0xd13   : > { %v863_v19 = vsel %vm862_vm14, %v1509_v11, %v859_v17  ;;  %v1002_v11 = vld [vmem:[%s1001_s26] sm:$0x3] }
 0xd14   : > { %v868_v21 = vsel %vm865_vm15, %v867_v18, %v863_v19 }
 0xd15   : > { %v870_v22 = vsel %vm1906_vm5, %v1511_v20, %v868_v21 }
 0xd16   : > { %878 = vrot.lane.b32.xlu0 %v870_v22, %s1698_s24  ;;  %v876_v26 = vmul.f32 %v874_v25, %v870_v22 }
 0xd88   : > { %v879_v23 = vpop.permute.xlu0 %878 }
 0xd89   : > { %v881_v24 = vmul.f32 %v879_v23, %v870_v22 }
 0xd8b   : > { %883 = vrot.lane.b32.xlu2 %v881_v24, %s1699_s27 }
 0xde5   : > { %v884_v27 = vpop.permute.xlu2 %883 }
 0xde6   : > { %v886_v28 = vadd.f32 %v884_v27, %v876_v26 }
 0xde8   : > { %1512 = vtanh.f32 %v886_v28  ;;  %894 = vrot.lane.b32.xlu2 %v886_v28, %s1700_s29 }
 0xdee   : > { %v1513_v29 = vpop.eup %1512 }
 0xdef   : > { %889 = vrot.lane.b32.xlu0 %v1513_v29, %s1698_s24 }
 0xe42   : > { %v895_v31 = vpop.permute.xlu2 %894 }
 0xe43   : > { %897 = vst.msk [vmem:[#allocation4] sm:$0x3] %vm332_vm0, %v895_v31 }
 0xe4a   : > { %v965_v35 = vld [vmem:[#allocation4] sm:$0x3] }
 0xe61   : > { %v890_v33 = vpop.permute.xlu0 %889 }
 0xe62   : > { %v892_v34 = vmul.f32 %v890_v33, %v870_v22 }
 0xe64   : > { %899 = vrot.lane.b32.xlu1 %v892_v34, %s1699_s27 }
 0xe6c   : > { %967 = vrot.lane.b32.xlu1 %v965_v35, %s1699_s27 }
 0xed6   : > { %v900_v37 = vpop.permute.xlu1 %899 }
 0xed7   : > { %902 = vst.msk [vmem:[#allocation3] sm:$0x3] %vm332_vm0, %v900_v37 }
 0xed8   : > { %904 = vst.msk [vmem:[%s903_s22] sm:$0x3] %vm332_vm0, %v900_v37 }
 0xede   : > { %v909_v38 = vld [vmem:[#allocation3] sm:$0x3]  ;;  %v968_v61 = vpop.permute.xlu1 %967 }
 0xedf   : > { %v910_v39 = vpack.c.bf16 %v909_v38, %v909_v38 }
 0xee1   : > { %1354 = vmatmul.msk.bf16.vlgmr.msrb.gmra.mxu3 %vm312_vm1, %v910_v39 }
 0xf64   : > { %v939_v41 = vpop.f32.mrf.mxu3 }
 0xf65   : > { %v943_v42 = vadd.f32 %v939_v41, %v908_v40 }
 0xf67   : > { %v1355_v43 = vmul.f32 -1.442695, %v943_v42 }
 0xf69   : > { %1514 = vpow2.f32 %v1355_v43 }
 0xf6c   : > { %v941_v44 = vpop.f32.mrf.mxu3 }
 0xf6f   : > { %v1515_v45 = vpop.eup %1514 }
 0xf70   : > { %v948_v46 = vadd.f32 1.0, %v1515_v45 }
 0xf72   : > { %1516 = vrcp.f32 %v948_v46  ;;  %v960_v50 = vand.u32 2147483648, %v948_v46  ;;  %v958_v52 = vand.u32 2147483647, %v948_v46  ;;  %vm954_vm3 = vweird.f32 %v948_v46 }
 0xf73   : > { %1518 = vtanh.f32 %v943_v42 }
 0xf74   : > { %v961_v54 = vor.u32 1.1754944e-38, %v960_v50  ;;  %vm959_vm6 = vcmp.eq.f32.partialorder %v958_v52, 8.507059e+37 }
 0xf78   : > { %v1517_v47 = vpop.eup %1516 }
 0xf79   : > { %v950_v48 = vmul.f32 %v1517_v47, %v948_v46  ;;  %vm955_vm2 = vweird.f32 %v1517_v47  ;;  %v1519_v56 = vpop.eup %1518 }
 0xf7a   : > { %vm956_vm4 = vmor %vm954_vm3, %vm955_vm2 }
 0xf7b   : > { %v951_v49 = vsub.f32 1.0, %v950_v48 }
 0xf7d   : > { %v952_v51 = vmul.f32 %v1517_v47, %v951_v49 }
 0xf7f   : > { %v953_v53 = vadd.f32 %v1517_v47, %v952_v51 }
 0xf81   : > { %v957_v55 = vsel %vm956_vm4, %v1517_v47, %v953_v53 }
 0xf82   : > { %v962_v57 = vsel %vm959_vm6, %v961_v54, %v957_v55 }
 0xf83   : > { %v964_v58 = vsel %vm1906_vm5, %v1519_v56, %v962_v57 }
 0xf84   : > { %972 = vrot.lane.b32.xlu0 %v964_v58, %s1698_s24  ;;  %v970_v62 = vmul.f32 %v968_v61, %v964_v58 }
 0xff6   : > { %v973_v59 = vpop.permute.xlu0 %972 }
 0xff7   : > { %v975_v60 = vmul.f32 %v973_v59, %v964_v58 }
 0xff9   : > { %977 = vrot.lane.b32.xlu2 %v975_v60, %s1699_s27 }
0x1053   : > { %v978_v63 = vpop.permute.xlu2 %977 }
0x1054   : > { %v980_v0 = vadd.f32 %v978_v63, %v970_v62 }
0x1056   : > { %1520 = vtanh.f32 %v980_v0  ;;  %988 = vrot.lane.b32.xlu2 %v980_v0, %s1700_s29 }
0x105c   : > { %v1521_v1 = vpop.eup %1520 }
0x105d   : > { %983 = vrot.lane.b32.xlu0 %v1521_v1, %s1698_s24 }
0x10b0   : > { %v989_v2 = vpop.permute.xlu2 %988 }
0x10b1   : > { %991 = vst.msk [vmem:[#allocation4] sm:$0x3] %vm332_vm0, %v989_v2 }
0x10b8   : > { %v1059_v6 = vld [vmem:[#allocation4] sm:$0x3] }
0x10cf   : > { %v984_v4 = vpop.permute.xlu0 %983 }
0x10d0   : > { %v986_v5 = vmul.f32 %v984_v4, %v964_v58 }
0x10d2   : > { %993 = vrot.lane.b32.xlu1 %v986_v5, %s1699_s27 }
0x10da   : > { %1061 = vrot.lane.b32.xlu1 %v1059_v6, %s1699_s27 }
0x1144   : > { %v994_v8 = vpop.permute.xlu1 %993 }
0x1145   : > { %996 = vst.msk [vmem:[#allocation3] sm:$0x3] %vm332_vm0, %v994_v8 }
0x1146   : > { %998 = vst.msk [vmem:[%s997_s12] sm:$0x3] %vm332_vm0, %v994_v8 }
0x114c   : > { %v1003_v9 = vld [vmem:[#allocation3] sm:$0x3]  ;;  %v1062_v33 = vpop.permute.xlu1 %1061 }
0x114d   : > { %v1004_v10 = vpack.c.bf16 %v1003_v9, %v1003_v9 }
0x114f   : > { %1365 = vmatmul.msk.bf16.vlgmr.msra.gmra.mxu0 %vm312_vm1, %v1004_v10 }
0x11cc   : > { %v1033_v12 = vpop.f32.mrf.mxu0 }
0x11cd   : > { %v1037_v13 = vadd.f32 %v1033_v12, %v1002_v11 }
0x11cf   : > { %v1366_v14 = vmul.f32 -1.442695, %v1037_v13 }
0x11d1   : > { %1522 = vpow2.f32 %v1366_v14 }
0x11d4   : > { %v1035_v15 = vpop.f32.mrf.mxu0 }
0x11d7   : > { %v1523_v16 = vpop.eup %1522 }
0x11d8   : > { %v1042_v17 = vadd.f32 1.0, %v1523_v16 }
0x11da   : > { %1524 = vrcp.f32 %v1042_v17  ;;  %v1054_v21 = vand.u32 2147483648, %v1042_v17  ;;  %v1052_v23 = vand.u32 2147483647, %v1042_v17  ;;  %vm1048_vm7 = vweird.f32 %v1042_v17 }
0x11db   : > { %1526 = vtanh.f32 %v1037_v13 }
0x11dc   : > { %v1055_v25 = vor.u32 1.1754944e-38, %v1054_v21  ;;  %vm1053_vm9 = vcmp.eq.f32.partialorder %v1052_v23, 8.507059e+37 }
0x11e0   : > { %v1525_v18 = vpop.eup %1524 }
0x11e1   : > { %v1044_v19 = vmul.f32 %v1525_v18, %v1042_v17  ;;  %vm1049_vm1 = vweird.f32 %v1525_v18  ;;  %v1527_v27 = vpop.eup %1526 }
0x11e2   : > { %vm1050_vm8 = vmor %vm1048_vm7, %vm1049_vm1 }
0x11e3   : > { %v1045_v20 = vsub.f32 1.0, %v1044_v19 }
0x11e5   : > { %v1046_v22 = vmul.f32 %v1525_v18, %v1045_v20 }
0x11e7   : > { %v1047_v24 = vadd.f32 %v1525_v18, %v1046_v22 }
0x11e9   : > { %v1051_v26 = vsel %vm1050_vm8, %v1525_v18, %v1047_v24 }
0x11ea   : > { %v1056_v28 = vsel %vm1053_vm9, %v1055_v25, %v1051_v26 }
0x11eb   : > { %v1058_v29 = vsel %vm1906_vm5, %v1527_v27, %v1056_v28 }
0x11ec   : > { %1066 = vrot.lane.b32.xlu0 %v1058_v29, %s1698_s24  ;;  %v1064_v34 = vmul.f32 %v1062_v33, %v1058_v29 }
0x125e   : > { %v1067_v31 = vpop.permute.xlu0 %1066 }
0x125f   : > { %v1069_v32 = vmul.f32 %v1067_v31, %v1058_v29 }
0x1261   : > { %1071 = vrot.lane.b32.xlu2 %v1069_v32, %s1699_s27 }
0x12bb   : > { %v1072_v35 = vpop.permute.xlu2 %1071 }
0x12bc   : > { %v1074_v36 = vadd.f32 %v1072_v35, %v1064_v34 }
0x12be   : > { %1528 = vtanh.f32 %v1074_v36  ;;  %1082 = vrot.lane.b32.xlu2 %v1074_v36, %s1700_s29  ;;  %s1091_s29 = scalar_lea.vmem %s1921_s9, %s1356_s14 [#allocation11]  ;;  %s1640_s9 = scalar_lea.hbm %s2134_s4, 32 }
0x12c4   : > { %v1529_v37 = vpop.eup %1528 }
0x12c5   : > { %1077 = vrot.lane.b32.xlu0 %v1529_v37, %s1698_s24  ;;  %s1094_s24 = scalar_lea.sflag [#allocation7], %s239_s23 }
0x1318   : > { %v1083_v30 = vpop.permute.xlu2 %1082 }
0x1319   : > { %1085 = vst.msk [vmem:[#allocation4] sm:$0x3] %vm332_vm0, %v1083_v30 }
0x1337   : > { %v1078_v38 = vpop.permute.xlu0 %1077 }
0x1338   : > { %v1080_v39 = vmul.f32 %v1078_v38, %v1058_v29 }
0x133a   : > { %1087 = vrot.lane.b32.xlu1 %v1080_v39, %s1699_s27  ;;  %s1634_s27 = sshra.s32 %s1109_s0, 4  ;;  %s1635_s27 = int_to_ptr.hbm [resolvable:$true] %s1634_s27 }
0x133b   : > { %s1636_s8 = scalar_lea.hbm %s1635_s27, 16  ;;  %p1641_p6 = scmp.lt.s32.totalorder %s1635_s27, %s2134_s4 }
0x133c   : > { %p1637_p0 = scmp.ne.s32.totalorder %s1635_s27, %s1636_s8  ;;  %p1642_p4 = scmp.lt.s32.totalorder %s1640_s9, %s1636_s8 }
0x133e   : > { %p1638_p8 = pnand %p1637_p0, %p1826_p11  ;;  %p1643_p9 = por %p1642_p4, %p1641_p6 }
0x1340   : > { %p1639_p3 = pneg %p1638_p8 }
0x1342   : > { %p1644_p1 = pnand %p1643_p9, %p1639_p3 }
0x13ac   : > { %v1088_v40 = vpop.permute.xlu1 %1087 }
0x13ad   : > { %1090 = vst.msk [vmem:[#allocation3] sm:$0x3] %vm332_vm0, %v1088_v40 }
0x13ae   : > { %1092 = vst.msk [vmem:[%s1091_s29] sm:$0x3] %vm332_vm0, %v1088_v40 }
0x13af   : > { %1647 = shalt.err (!%p1644_p1)
}
0x13b0   : > { %s1701_s23 = smov 128   ;;  %s1702_s5 = smov 8  }
0x13b1   : > { %1401 = dma.vmem_to_hbm [thread:$0]  (%p1826_p11), %s1107_s7, 256, %s1109_s0, %s1094_s24, %s1701_s23, %s1701_s23, %s1702_s5  }
0x13b2 PF: > { %s1123_s12 = sand.u32 1, %s1678_s15   ;;  %p2161_p2 = scmp.ge.s32.totalorder %s1690_s18, 2 }
0x13b3   : > { %s1124_s13 = scalar_lea.sflag [#allocation7], %s1123_s12 }
0x13b4   : > { %p1415_p5 = pnand %p2161_p2, %p1830_p12 }
0x13b6   : > { %p1416_p7 = pneg %p1415_p5 }
0x13b8   : > { %1673 = dma.done.wait (%p1416_p7), %s1124_s13, 256  }
0x13b9   : > { %1675 = vsyncadd (%p1416_p7), %s1124_s13, 4294967040  ;;  %s2162_s14 = sld [smem:[#allocation15_spill]]  ;;  %p18_p10 = scmp.ge.s32.totalorder %s1749_s19, 4  }
0x13ba   : > { %s2163_s15 = smov %s1682_s16  ;;  %s2164_s16 = smov %s1686_s17 }
0x13bb   : > { %s2166_s18 = smov %s1749_s19  ;;  %20 = sbr.rel (!%p18_p10) target bundleno = 9 (0x9), region = 116 }
0x13bf   : > { %s2165_s17 = smov %s2162_s14 }
0x13c0   :  { %1130 = vsyncpa [#allocation6], 1 }
0x13c1   :  { %1132 = vsyncpa [#allocation6 + $0x1], 1 }
0x13c2   :  { %1133 = vsyncpa [#allocation9], 1 }
0x13c3   :  { %1135 = vsyncpa [#allocation9 + $0x1], 1 }
0x13c4   :  { %1136 = vsyncpa [#allocation7], 1 }
0x13c5   :  { %1138 = vsyncpa [#allocation7 + $0x1], 1 }

</bundles_post_ra>
